<compile_context>
chip_gen: v5e
topology: v5e:2x2
jax: 0.10.0
libtpu: 0.0.40
codegen_flags: <defaults>
</compile_context>

<pallas_src>
import numpy as np
import jax
import jax.numpy as jnp
from jax.experimental import pallas as pl
from jax.experimental.pallas import tpu as pltpu


# ----------------------------------------------------------------------------
# Static combination bookkeeping (trace-time mirror of create_mask / the loop).
# ----------------------------------------------------------------------------
def _create_mask(m):
    """m: (R, C) bool.  Combos = true entries of rows 0..R-2, row-major order.
    Returned mask[i, k] == 1 iff the field of row (i+1) can extend combo k."""
    r_dim, c_dim = m.shape
    rows = [i for i in range(r_dim - 1) for j in range(c_dim) if m[i, j]]
    mask = np.zeros((r_dim - 1, len(rows)), dtype=bool)
    for k, r in enumerate(rows):
        mask[r:, k] = True
    return mask


def _build_combos(num_field, order):
    """Mirror of the reference interaction loop.

    Returns:
      combos    : list (global pair order) of field-index lists whose elementwise
                  embedding product is that combination
      plan_meta : per interaction order t=2..order, (num_pairs, num_surviving)
    """
    combos, plan_meta = [], []
    mask = _create_mask(np.eye(num_field, dtype=bool))
    prev = [[f] for f in range(num_field - 1)]          # initial combos = fields 0..F-2
    for t in range(2, order + 1):
        pairs = [(i, k) for i in range(mask.shape[0])
                 for k in range(mask.shape[1]) if mask[i, k]]
        cur = [[t - 1 + i] + prev[k] for (i, k) in pairs]
        combos.extend(cur)
        m_minus = mask.copy()
        if m_minus.size:
            m_minus[-1, :] = False
        k_next = int(m_minus.sum())
        plan_meta.append((len(pairs), k_next))
        prev = cur[:k_next]
        mask = _create_mask(m_minus)
    return combos, plan_meta


def _round_up(x, m):
    return (x + m - 1) // m * m


def _vmem_capacity_bytes():
    try:
        return int(pltpu.get_tpu_info().vmem_capacity_bytes)
    except Exception:
        return 64 * 1024 * 1024          # conservative (v7x-sized) fallback


# ----------------------------------------------------------------------------
# Pallas kernel (one batch tile of TB rows per grid step)
# ----------------------------------------------------------------------------
def _make_kernel(TB, S_total, order_count, beta, reg_lo, reg_hi):
    f32 = jnp.float32
    bf16 = jnp.bfloat16

    def kernel(w0_ref, aux_ref, Vx_ref, Zx_ref,
               WG_ref, pad_ref, ones_ref,
               pW0_ref, pb0_ref, pW1_ref, pb1_ref, pW2_ref, pb2_ref,
               dW0_ref, db0_ref, dW1_ref, db1_ref, dW2_ref, db2_ref,
               out_ref):
        aux = aux_ref[...]                      # (TB, 2+S)  f32: [sum w, sum w^2, eps...]
        Vxf = Vx_ref[...]                       # (TB, L*d)  bf16
        Zxf = Zx_ref[...]                       # (TB, L*d)  bf16

        # --- deep branch: first layer fused with field aggregation (bf16 x bf16 MXU)
        h = jnp.maximum(
            jnp.dot(Vxf, dW0_ref[...], preferred_element_type=f32) + db0_ref[...], 0.0)
        h = jnp.maximum(
            jnp.dot(h.astype(bf16), dW1_ref[...], preferred_element_type=f32)
            + db1_ref[...], 0.0)
        deep = (jnp.dot(h.astype(bf16), dW2_ref[...], preferred_element_type=f32)
                + db2_ref[...])                                        # (TB, 1)

        wx_sum = aux[:, 0:1]
        wx_sq = aux[:, 1:2]
        y = w0_ref[...] + wx_sum + deep                                # (TB, 1)

        reg_row = jnp.zeros((TB, 1), f32)
        if S_total > 0:
            # --- lane-dense pair products:  pv/pz = prod_m (X @ WG_m + pad_m)
            pv = None
            pz = None
            for m in range(order_count):
                WGm = WG_ref[m]                                        # (L*d, S*d) bf16
                padm = pad_ref[m]                                      # (1,   S*d) f32
                fV = jnp.dot(Vxf, WGm, preferred_element_type=f32) + padm
                fZ = jnp.dot(Zxf, WGm, preferred_element_type=f32) + padm
                pv = fV if pv is None else pv * fV
                pz = fZ if pz is None else pz * fZ

            # per-pair inner products:  Ws[b, s] = sum_j pv[b, s*d + j]
            Ws = jnp.dot(pv, ones_ref[...], preferred_element_type=f32)   # (TB, S)

            # block-diagonal policy MLP: all S pairs in one fused 3-layer MLP
            ph = jnp.maximum(
                jnp.dot(pz.astype(bf16), pW0_ref[...], preferred_element_type=f32)
                + pb0_ref[...], 0.0)
            ph = jnp.maximum(
                jnp.dot(ph.astype(bf16), pW1_ref[...], preferred_element_type=f32)
                + pb1_ref[...], 0.0)
            pro = jax.nn.sigmoid(
                jnp.dot(ph.astype(bf16), pW2_ref[...], preferred_element_type=f32)
                + pb2_ref[...])                                           # (TB, S)

            eps = aux[:, 2:2 + S_total]                                   # (TB, S)
            gated = Ws * (pro >= eps).astype(f32)                         # hard gate
            y = y + jnp.sum(gated, axis=1, keepdims=True)

            # regulariser: surviving last-order combos (static lane slice of pv)
            if reg_hi > reg_lo:
                surv = pv[:, reg_lo:reg_hi]
                reg_row = jnp.sum(surv * surv, axis=1, keepdims=True)

        out_ref[:, 0:1] = y
        out_ref[:, 1:2] = beta * (wx_sq + reg_row)     # per-row reg; wrapper sums

    return kernel


# ----------------------------------------------------------------------------
# Wrapper
# ----------------------------------------------------------------------------
def sdeepfis_forward(x, eps, params, M, *, order, beta, batch_tile=None):
    B, L = x.shape
    F = M.shape[0]
    d = params["V"].shape[1]
    f32, bf16 = jnp.float32, jnp.bfloat16

    combos, plan_meta = _build_combos(F, order)
    S_total = len(combos)
    order_count = max((len(c) for c in combos), default=0)
    S_eff = max(S_total, 1)
    oc_eff = max(order_count, 1)

    # --- per-generation tile / VMEM budget
    vmem_cap = _vmem_capacity_bytes()
    if batch_tile is None:
        batch_tile = 512 if vmem_cap >= (96 << 20) else 256
    TB = batch_tile if B >= batch_tile else _round_up(max(B, 1), 8)
    B_pad = _round_up(B, TB)
    nb = B_pad // TB
    pad = B_pad - B

    # --- per-row scalar glue precomputed host-side (drops the (TB, L) wx block)
    wx = params["w"][x].astype(f32)                                   # (B, L)
    wx_sum = jnp.sum(wx, axis=1, keepdims=True)
    wx_sq = jnp.sum(wx * wx, axis=1, keepdims=True)
    cols = [wx_sum, wx_sq] + ([eps.astype(f32)] if S_total > 0 else [])
    aux = jnp.concatenate(cols, axis=1)                               # (B, 2+S)
    aux_p = jnp.pad(aux, ((0, pad), (0, 0)))

    # --- embedding gathers (glue); bf16 halves the dominant HBM traffic
    Vxf_p = jnp.pad(params["V"][x].astype(bf16).reshape(B, L * d), ((0, pad), (0, 0)))
    Zxf_p = jnp.pad(params["Z"][x].astype(bf16).reshape(B, L * d), ((0, pad), (0, 0)))

    M_np = np.asarray(M, dtype=np.float32)

    # --- host-built selection matrices: pair products become lane-dense MXU matmuls.
    #     WG_m fuses kron(M^T, I_d) field aggregation with the m-th field pick of
    #     each combination; pad_m injects the multiplicative identity for combos of
    #     lower order than m+1.
    WG_np = np.zeros((oc_eff, L * d, S_eff * d), np.float32)
    pad_np = np.zeros((oc_eff, 1, S_eff * d), np.float32)
    eye_d = np.eye(d, dtype=np.float32)
    for s, fs in enumerate(combos):
        for m in range(oc_eff):
            if m < len(fs):
                WG_np[m, :, s * d:(s + 1) * d] = np.kron(M_np[fs[m]][:, None], eye_d)
            else:
                pad_np[m, 0, s * d:(s + 1) * d] = 1.0
    WG = jnp.asarray(WG_np, bf16)
    pads = jnp.asarray(pad_np, f32)
    ones_blk = jnp.asarray(np.kron(np.eye(S_eff, dtype=np.float32),
                                   np.ones((d, 1), np.float32)), f32)   # (S*d, S)

    # --- block-diagonal policy MLP weights (one fused MLP over all S pairs)
    eyeS = jnp.eye(S_eff, dtype=f32)
    pW0blk = jnp.kron(eyeS, params["pW0"].astype(f32)).astype(bf16)
    pW1blk = jnp.kron(eyeS, params["pW1"].astype(f32)).astype(bf16)
    pW2blk = jnp.kron(eyeS, params["pW2"].astype(f32)).astype(bf16)
    pb0blk = jnp.tile(params["pb0"].astype(f32), (1, S_eff))
    pb1blk = jnp.tile(params["pb1"].astype(f32), (1, S_eff))
    pb2blk = jnp.tile(params["pb2"].astype(f32), (1, S_eff))

    # --- deep MLP, first layer fused with the field aggregation kron(M^T, I_d)
    Wk = jnp.kron(jnp.asarray(M_np).T, jnp.eye(d, dtype=f32))          # (L*d, F*d)
    dW0_eff = jnp.dot(Wk, params["dW0"].astype(f32)).astype(bf16)      # (L*d, D0)
    dW1 = params["dW1"].astype(bf16)
    dW2 = params["dW2"].astype(bf16)
    db0 = params["db0"].astype(f32)
    db1 = params["db1"].astype(f32)
    db2 = params["db2"].astype(f32)
    w0 = params["w0"].astype(f32)

    # surviving last-order combos for the regulariser trace (static lane window)
    if plan_meta:
        P_last, k_last = plan_meta[-1]
        reg_lo = (S_total - P_last) * d
        reg_hi = reg_lo + k_last * d
    else:
        reg_lo = reg_hi = 0

    def full(a):
        nd = a.ndim
        return pl.BlockSpec(a.shape, lambda b, _nd=nd: (0,) * _nd)

    aux_w = aux_p.shape[1]
    in_arrays = [w0, aux_p, Vxf_p, Zxf_p, WG, pads, ones_blk,
                 pW0blk, pb0blk, pW1blk, pb1blk, pW2blk, pb2blk,
                 dW0_eff, db0, dW1, db1, dW2, db2]
    in_specs = [
        full(w0),
        pl.BlockSpec((TB, aux_w), lambda b: (b, 0)),
        pl.BlockSpec((TB, L * d), lambda b: (b, 0)),
        pl.BlockSpec((TB, L * d), lambda b: (b, 0)),
        full(WG), full(pads), full(ones_blk),
        full(pW0blk), full(pb0blk), full(pW1blk), full(pb1blk),
        full(pW2blk), full(pb2blk),
        full(dW0_eff), full(db0), full(dW1), full(db1), full(dW2), full(db2),
    ]
    out_specs = pl.BlockSpec((TB, 2), lambda b: (b, 0))
    out_shape = jax.ShapeDtypeStruct((B_pad, 2), f32)

    H0, H1 = params["pW0"].shape[1], params["pW1"].shape[1]
    D0, D1 = params["dW0"].shape[1], params["dW1"].shape[1]
    flops = 2 * B_pad * (
        L * d * D0 + D0 * D1 + D1
        + 2 * oc_eff * (L * d) * (S_eff * d)
        + (S_eff * d) * S_eff
        + (S_eff * d) * (S_eff * H0) + (S_eff * H0) * (S_eff * H1) + (S_eff * H1) * S_eff)
    bytes_accessed = sum(int(np.prod(a.shape)) * a.dtype.itemsize
                         for a in in_arrays) + B_pad * 2 * 4
    cost = pl.CostEstimate(flops=int(flops),
                           transcendentals=int(B_pad * S_eff),
                           bytes_accessed=int(bytes_accessed))

    out = pl.pallas_call(
        _make_kernel(TB, S_total, order_count, float(beta), reg_lo, reg_hi),
        out_shape=out_shape,
        grid=(nb,),
        in_specs=in_specs,
        out_specs=out_specs,
        compiler_params=pltpu.CompilerParams(
            dimension_semantics=("parallel",),      # reg is per-row now; no shared accumulator
            vmem_limit_bytes=int(min(vmem_cap * 3 // 4, 100 * 1024 * 1024))),
        cost_estimate=cost,
    )(*in_arrays)

    y = out[:B, 0]
    reg = jnp.sum(out[:, 1])        # padded rows contribute exactly 0
    return y, reg


# ----------------------------------------------------------------------------
# Demo
# ----------------------------------------------------------------------------
if __name__ == "__main__":
    B, L, F, d, n = 8, 6, 4, 16, 64
    order = 3
    beta = 0.01
    policy_layer = [32, 16]
    deep_layer = [64, 32]

    # field membership matrix M (F, L): each raw feature belongs to one field
    field_of_feature = np.array([0, 0, 1, 2, 2, 3])
    M_np = np.zeros((F, L), dtype=np.float32)
    M_np[field_of_feature, np.arange(L)] = 1.0
    M = jnp.asarray(M_np)

    key = jax.random.PRNGKey(0)
    ks = jax.random.split(key, 18)
    init = lambda k, shape, s=0.01: (jax.random.normal(k, shape, jnp.float32) * s)

    params = {
        "w0": init(ks[0], (1, 1)),
        "w":  init(ks[1], (n,)),
        "V":  init(ks[2], (n, d), 0.1),
        "Z":  init(ks[3], (n, d), 0.1),
        # policy MLP: [d] + policy_layer + [1]
        "pW0": init(ks[4], (d, policy_layer[0]), 0.1),
        "pb0": init(ks[5], (1, policy_layer[0]), 0.1),
        "pW1": init(ks[6], (policy_layer[0], policy_layer[1]), 0.1),
        "pb1": init(ks[7], (1, policy_layer[1]), 0.1),
        "pW2": init(ks[8], (policy_layer[1], 1), 0.1),
        "pb2": init(ks[9], (1, 1), 0.1),
        # deep MLP: [F*d] + deep_layer + [1]
        "dW0": init(ks[10], (F * d, deep_layer[0]), 0.1),
        "db0": init(ks[11], (1, deep_layer[0]), 0.1),
        "dW1": init(ks[12], (deep_layer[0], deep_layer[1]), 0.1),
        "db1": init(ks[13], (1, deep_layer[1]), 0.1),
        "dW2": init(ks[14], (deep_layer[1], 1), 0.1),
        "db2": init(ks[15], (1, 1), 0.1),
    }

    x = jax.random.randint(ks[16], (B, L), 0, n, dtype=jnp.int32)
    s_total = len(_build_combos(F, order)[0])
    eps = jax.random.uniform(ks[17], (B, s_total), jnp.float32)

    y, regular = sdeepfis_forward(x, eps, params, M, order=order, beta=beta)
    jax.block_until_ready((y, regular))
    assert y.shape == (B,) and regular.shape == ()
    assert bool(jnp.all(jnp.isfinite(y))) and bool(jnp.isfinite(regular))
    print("KERNEL_OK")
</pallas_src>

<mosaic_0001>
module attributes {stable_mosaic.version = 11 : i64} {
  func.func @kernel(%arg0: i32, %arg1: memref<1x1xf32, #tpu.memory_space<vmem>>, %arg2: memref<8x12xf32, #tpu.memory_space<vmem>>, %arg3: memref<8x96xbf16, #tpu.memory_space<vmem>>, %arg4: memref<8x96xbf16, #tpu.memory_space<vmem>>, %arg5: memref<3x96x160xbf16, #tpu.memory_space<vmem>>, %arg6: memref<3x1x160xf32, #tpu.memory_space<vmem>>, %arg7: memref<160x10xf32, #tpu.memory_space<vmem>>, %arg8: memref<160x320xbf16, #tpu.memory_space<vmem>>, %arg9: memref<1x320xf32, #tpu.memory_space<vmem>>, %arg10: memref<320x160xbf16, #tpu.memory_space<vmem>>, %arg11: memref<1x160xf32, #tpu.memory_space<vmem>>, %arg12: memref<160x10xbf16, #tpu.memory_space<vmem>>, %arg13: memref<1x10xf32, #tpu.memory_space<vmem>>, %arg14: memref<96x64xbf16, #tpu.memory_space<vmem>>, %arg15: memref<1x64xf32, #tpu.memory_space<vmem>>, %arg16: memref<64x32xbf16, #tpu.memory_space<vmem>>, %arg17: memref<1x32xf32, #tpu.memory_space<vmem>>, %arg18: memref<32x1xbf16, #tpu.memory_space<vmem>>, %arg19: memref<1x1xf32, #tpu.memory_space<vmem>>, %arg20: memref<8x2xf32, #tpu.memory_space<vmem>>) attributes {dimension_semantics = [#tpu.dimension_semantics<parallel>], iteration_bounds = array<i64: 1>, scalar_prefetch = 0 : i64, scratch_operands = 0 : i64, tpu.core_type = #tpu.core_type<tc>, window_params = [{pipeline_mode = #tpu.pipeline_mode<synchronous>, transform_indices = @transform_0, window_bounds = array<i64: 1, 1>}, {transform_indices = @transform_1, window_bounds = array<i64: 8, 12>}, {transform_indices = @transform_2, window_bounds = array<i64: 8, 96>}, {transform_indices = @transform_3, window_bounds = array<i64: 8, 96>}, {pipeline_mode = #tpu.pipeline_mode<synchronous>, transform_indices = @transform_4, window_bounds = array<i64: 3, 96, 160>}, {pipeline_mode = #tpu.pipeline_mode<synchronous>, transform_indices = @transform_5, window_bounds = array<i64: 3, 1, 160>}, {pipeline_mode = #tpu.pipeline_mode<synchronous>, transform_indices = @transform_6, window_bounds = array<i64: 160, 10>}, {pipeline_mode = #tpu.pipeline_mode<synchronous>, transform_indices = @transform_7, window_bounds = array<i64: 160, 320>}, {pipeline_mode = #tpu.pipeline_mode<synchronous>, transform_indices = @transform_8, window_bounds = array<i64: 1, 320>}, {pipeline_mode = #tpu.pipeline_mode<synchronous>, transform_indices = @transform_9, window_bounds = array<i64: 320, 160>}, {pipeline_mode = #tpu.pipeline_mode<synchronous>, transform_indices = @transform_10, window_bounds = array<i64: 1, 160>}, {pipeline_mode = #tpu.pipeline_mode<synchronous>, transform_indices = @transform_11, window_bounds = array<i64: 160, 10>}, {pipeline_mode = #tpu.pipeline_mode<synchronous>, transform_indices = @transform_12, window_bounds = array<i64: 1, 10>}, {pipeline_mode = #tpu.pipeline_mode<synchronous>, transform_indices = @transform_13, window_bounds = array<i64: 96, 64>}, {pipeline_mode = #tpu.pipeline_mode<synchronous>, transform_indices = @transform_14, window_bounds = array<i64: 1, 64>}, {pipeline_mode = #tpu.pipeline_mode<synchronous>, transform_indices = @transform_15, window_bounds = array<i64: 64, 32>}, {pipeline_mode = #tpu.pipeline_mode<synchronous>, transform_indices = @transform_16, window_bounds = array<i64: 1, 32>}, {pipeline_mode = #tpu.pipeline_mode<synchronous>, transform_indices = @transform_17, window_bounds = array<i64: 32, 1>}, {pipeline_mode = #tpu.pipeline_mode<synchronous>, transform_indices = @transform_18, window_bounds = array<i64: 1, 1>}, {transform_indices = @transform_19, window_bounds = array<i64: 8, 2>}]} {
    %c0 = arith.constant 0 : index
    %c0_0 = arith.constant 0 : index
    %0 = vector.load %arg2[%c0, %c0_0] : memref<8x12xf32, #tpu.memory_space<vmem>>, vector<8x12xf32>
    %c0_1 = arith.constant 0 : index
    %c0_2 = arith.constant 0 : index
    %1 = vector.load %arg3[%c0_1, %c0_2] : memref<8x96xbf16, #tpu.memory_space<vmem>>, vector<8x96xbf16>
    %c0_3 = arith.constant 0 : index
    %c0_4 = arith.constant 0 : index
    %2 = vector.load %arg4[%c0_3, %c0_4] : memref<8x96xbf16, #tpu.memory_space<vmem>>, vector<8x96xbf16>
    %c0_5 = arith.constant 0 : index
    %c0_6 = arith.constant 0 : index
    %3 = vector.load %arg14[%c0_5, %c0_6] : memref<96x64xbf16, #tpu.memory_space<vmem>>, vector<96x64xbf16>
    %cst = arith.constant dense<0.000000e+00> : vector<8x64xf32>
    %4 = tpu.matmul %1, %3, %cst {dimension_numbers = #tpu.dot_dimension_numbers<[1], [0], [0], [1], [0, 0, 1, 1], [], []>} : vector<8x96xbf16>, vector<96x64xbf16>, vector<8x64xf32> -> vector<8x64xf32>
    %c0_7 = arith.constant 0 : index
    %c0_8 = arith.constant 0 : index
    %5 = vector.load %arg15[%c0_7, %c0_8] : memref<1x64xf32, #tpu.memory_space<vmem>>, vector<1x64xf32>
    %6 = vector.broadcast %5 : vector<1x64xf32> to vector<8x64xf32>
    %7 = arith.addf %4, %6 : vector<8x64xf32>
    %cst_9 = arith.constant 0.000000e+00 : f32
    %8 = vector.broadcast %cst_9 : f32 to vector<8x64xf32>
    %9 = arith.maximumf %7, %8 : vector<8x64xf32>
    %10 = arith.truncf %9 : vector<8x64xf32> to vector<8x64xbf16>
    %c0_10 = arith.constant 0 : index
    %c0_11 = arith.constant 0 : index
    %11 = vector.load %arg16[%c0_10, %c0_11] : memref<64x32xbf16, #tpu.memory_space<vmem>>, vector<64x32xbf16>
    %cst_12 = arith.constant dense<0.000000e+00> : vector<8x32xf32>
    %12 = tpu.matmul %10, %11, %cst_12 {dimension_numbers = #tpu.dot_dimension_numbers<[1], [0], [0], [1], [0, 0, 1, 1], [], []>} : vector<8x64xbf16>, vector<64x32xbf16>, vector<8x32xf32> -> vector<8x32xf32>
    %c0_13 = arith.constant 0 : index
    %c0_14 = arith.constant 0 : index
    %13 = vector.load %arg17[%c0_13, %c0_14] : memref<1x32xf32, #tpu.memory_space<vmem>>, vector<1x32xf32>
    %14 = vector.broadcast %13 : vector<1x32xf32> to vector<8x32xf32>
    %15 = arith.addf %12, %14 : vector<8x32xf32>
    %cst_15 = arith.constant 0.000000e+00 : f32
    %16 = vector.broadcast %cst_15 : f32 to vector<8x32xf32>
    %17 = arith.maximumf %15, %16 : vector<8x32xf32>
    %18 = arith.truncf %17 : vector<8x32xf32> to vector<8x32xbf16>
    %c0_16 = arith.constant 0 : index
    %c0_17 = arith.constant 0 : index
    %19 = vector.load %arg18[%c0_16, %c0_17] : memref<32x1xbf16, #tpu.memory_space<vmem>>, vector<32x1xbf16>
    %cst_18 = arith.constant dense<0.000000e+00> : vector<8x1xf32>
    %20 = tpu.matmul %18, %19, %cst_18 {dimension_numbers = #tpu.dot_dimension_numbers<[1], [0], [0], [1], [0, 0, 1, 1], [], []>} : vector<8x32xbf16>, vector<32x1xbf16>, vector<8x1xf32> -> vector<8x1xf32>
    %c0_19 = arith.constant 0 : index
    %c0_20 = arith.constant 0 : index
    %21 = vector.load %arg19[%c0_19, %c0_20] : memref<1x1xf32, #tpu.memory_space<vmem>>, vector<1x1xf32>
    %22 = vector.broadcast %21 : vector<1x1xf32> to vector<8x1xf32>
    %23 = arith.addf %20, %22 : vector<8x1xf32>
    %24 = vector.extract_strided_slice %0 {offsets = [0, 0], sizes = [8, 1], strides = [1, 1]} : vector<8x12xf32> to vector<8x1xf32>
    %25 = vector.extract_strided_slice %0 {offsets = [0, 1], sizes = [8, 1], strides = [1, 1]} : vector<8x12xf32> to vector<8x1xf32>
    %c0_21 = arith.constant 0 : index
    %c0_22 = arith.constant 0 : index
    %26 = vector.load %arg1[%c0_21, %c0_22] : memref<1x1xf32, #tpu.memory_space<vmem>>, vector<1x1xf32>
    %27 = vector.broadcast %26 : vector<1x1xf32> to vector<8x1xf32>
    %28 = arith.addf %27, %24 : vector<8x1xf32>
    %29 = arith.addf %28, %23 : vector<8x1xf32>
    %c0_23 = arith.constant 0 : index
    %c0_24 = arith.constant 0 : index
    %c0_25 = arith.constant 0 : index
    %30 = vector.load %arg5[%c0_23, %c0_24, %c0_25] : memref<3x96x160xbf16, #tpu.memory_space<vmem>>, vector<1x96x160xbf16>
    %31 = vector.shape_cast %30 : vector<1x96x160xbf16> to vector<96x160xbf16>
    %c0_26 = arith.constant 0 : index
    %c0_27 = arith.constant 0 : index
    %c0_28 = arith.constant 0 : index
    %32 = vector.load %arg6[%c0_26, %c0_27, %c0_28] : memref<3x1x160xf32, #tpu.memory_space<vmem>>, vector<1x1x160xf32>
    %33 = vector.shape_cast %32 : vector<1x1x160xf32> to vector<1x160xf32>
    %cst_29 = arith.constant dense<0.000000e+00> : vector<8x160xf32>
    %34 = tpu.matmul %1, %31, %cst_29 {dimension_numbers = #tpu.dot_dimension_numbers<[1], [0], [0], [1], [0, 0, 1, 1], [], []>} : vector<8x96xbf16>, vector<96x160xbf16>, vector<8x160xf32> -> vector<8x160xf32>
    %35 = vector.broadcast %33 : vector<1x160xf32> to vector<8x160xf32>
    %36 = arith.addf %34, %35 : vector<8x160xf32>
    %cst_30 = arith.constant dense<0.000000e+00> : vector<8x160xf32>
    %37 = tpu.matmul %2, %31, %cst_30 {dimension_numbers = #tpu.dot_dimension_numbers<[1], [0], [0], [1], [0, 0, 1, 1], [], []>} : vector<8x96xbf16>, vector<96x160xbf16>, vector<8x160xf32> -> vector<8x160xf32>
    %38 = vector.broadcast %33 : vector<1x160xf32> to vector<8x160xf32>
    %39 = arith.addf %37, %38 : vector<8x160xf32>
    %c1 = arith.constant 1 : index
    %c0_31 = arith.constant 0 : index
    %c0_32 = arith.constant 0 : index
    %40 = vector.load %arg5[%c1, %c0_31, %c0_32] : memref<3x96x160xbf16, #tpu.memory_space<vmem>>, vector<1x96x160xbf16>
    %41 = vector.shape_cast %40 : vector<1x96x160xbf16> to vector<96x160xbf16>
    %c1_33 = arith.constant 1 : index
    %c0_34 = arith.constant 0 : index
    %c0_35 = arith.constant 0 : index
    %42 = vector.load %arg6[%c1_33, %c0_34, %c0_35] : memref<3x1x160xf32, #tpu.memory_space<vmem>>, vector<1x1x160xf32>
    %43 = vector.shape_cast %42 : vector<1x1x160xf32> to vector<1x160xf32>
    %cst_36 = arith.constant dense<0.000000e+00> : vector<8x160xf32>
    %44 = tpu.matmul %1, %41, %cst_36 {dimension_numbers = #tpu.dot_dimension_numbers<[1], [0], [0], [1], [0, 0, 1, 1], [], []>} : vector<8x96xbf16>, vector<96x160xbf16>, vector<8x160xf32> -> vector<8x160xf32>
    %45 = vector.broadcast %43 : vector<1x160xf32> to vector<8x160xf32>
    %46 = arith.addf %44, %45 : vector<8x160xf32>
    %cst_37 = arith.constant dense<0.000000e+00> : vector<8x160xf32>
    %47 = tpu.matmul %2, %41, %cst_37 {dimension_numbers = #tpu.dot_dimension_numbers<[1], [0], [0], [1], [0, 0, 1, 1], [], []>} : vector<8x96xbf16>, vector<96x160xbf16>, vector<8x160xf32> -> vector<8x160xf32>
    %48 = vector.broadcast %43 : vector<1x160xf32> to vector<8x160xf32>
    %49 = arith.addf %47, %48 : vector<8x160xf32>
    %50 = arith.mulf %36, %46 : vector<8x160xf32>
    %51 = arith.mulf %39, %49 : vector<8x160xf32>
    %c2 = arith.constant 2 : index
    %c0_38 = arith.constant 0 : index
    %c0_39 = arith.constant 0 : index
    %52 = vector.load %arg5[%c2, %c0_38, %c0_39] : memref<3x96x160xbf16, #tpu.memory_space<vmem>>, vector<1x96x160xbf16>
    %53 = vector.shape_cast %52 : vector<1x96x160xbf16> to vector<96x160xbf16>
    %c2_40 = arith.constant 2 : index
    %c0_41 = arith.constant 0 : index
    %c0_42 = arith.constant 0 : index
    %54 = vector.load %arg6[%c2_40, %c0_41, %c0_42] : memref<3x1x160xf32, #tpu.memory_space<vmem>>, vector<1x1x160xf32>
    %55 = vector.shape_cast %54 : vector<1x1x160xf32> to vector<1x160xf32>
    %cst_43 = arith.constant dense<0.000000e+00> : vector<8x160xf32>
    %56 = tpu.matmul %1, %53, %cst_43 {dimension_numbers = #tpu.dot_dimension_numbers<[1], [0], [0], [1], [0, 0, 1, 1], [], []>} : vector<8x96xbf16>, vector<96x160xbf16>, vector<8x160xf32> -> vector<8x160xf32>
    %57 = vector.broadcast %55 : vector<1x160xf32> to vector<8x160xf32>
    %58 = arith.addf %56, %57 : vector<8x160xf32>
    %cst_44 = arith.constant dense<0.000000e+00> : vector<8x160xf32>
    %59 = tpu.matmul %2, %53, %cst_44 {dimension_numbers = #tpu.dot_dimension_numbers<[1], [0], [0], [1], [0, 0, 1, 1], [], []>} : vector<8x96xbf16>, vector<96x160xbf16>, vector<8x160xf32> -> vector<8x160xf32>
    %60 = vector.broadcast %55 : vector<1x160xf32> to vector<8x160xf32>
    %61 = arith.addf %59, %60 : vector<8x160xf32>
    %62 = arith.mulf %50, %58 : vector<8x160xf32>
    %63 = arith.mulf %51, %61 : vector<8x160xf32>
    %c0_45 = arith.constant 0 : index
    %c0_46 = arith.constant 0 : index
    %64 = vector.load %arg7[%c0_45, %c0_46] : memref<160x10xf32, #tpu.memory_space<vmem>>, vector<160x10xf32>
    %cst_47 = arith.constant dense<0.000000e+00> : vector<8x10xf32>
    %65 = tpu.matmul %62, %64, %cst_47 {dimension_numbers = #tpu.dot_dimension_numbers<[1], [0], [0], [1], [0, 0, 1, 1], [], []>} : vector<8x160xf32>, vector<160x10xf32>, vector<8x10xf32> -> vector<8x10xf32>
    %66 = arith.truncf %63 : vector<8x160xf32> to vector<8x160xbf16>
    %c0_48 = arith.constant 0 : index
    %c0_49 = arith.constant 0 : index
    %67 = vector.load %arg8[%c0_48, %c0_49] : memref<160x320xbf16, #tpu.memory_space<vmem>>, vector<160x320xbf16>
    %cst_50 = arith.constant dense<0.000000e+00> : vector<8x320xf32>
    %68 = tpu.matmul %66, %67, %cst_50 {dimension_numbers = #tpu.dot_dimension_numbers<[1], [0], [0], [1], [0, 0, 1, 1], [], []>} : vector<8x160xbf16>, vector<160x320xbf16>, vector<8x320xf32> -> vector<8x320xf32>
    %c0_51 = arith.constant 0 : index
    %c0_52 = arith.constant 0 : index
    %69 = vector.load %arg9[%c0_51, %c0_52] : memref<1x320xf32, #tpu.memory_space<vmem>>, vector<1x320xf32>
    %70 = vector.broadcast %69 : vector<1x320xf32> to vector<8x320xf32>
    %71 = arith.addf %68, %70 : vector<8x320xf32>
    %cst_53 = arith.constant 0.000000e+00 : f32
    %72 = vector.broadcast %cst_53 : f32 to vector<8x320xf32>
    %73 = arith.maximumf %71, %72 : vector<8x320xf32>
    %74 = arith.truncf %73 : vector<8x320xf32> to vector<8x320xbf16>
    %c0_54 = arith.constant 0 : index
    %c0_55 = arith.constant 0 : index
    %75 = vector.load %arg10[%c0_54, %c0_55] : memref<320x160xbf16, #tpu.memory_space<vmem>>, vector<320x160xbf16>
    %cst_56 = arith.constant dense<0.000000e+00> : vector<8x160xf32>
    %76 = tpu.matmul %74, %75, %cst_56 {dimension_numbers = #tpu.dot_dimension_numbers<[1], [0], [0], [1], [0, 0, 1, 1], [], []>} : vector<8x320xbf16>, vector<320x160xbf16>, vector<8x160xf32> -> vector<8x160xf32>
    %c0_57 = arith.constant 0 : index
    %c0_58 = arith.constant 0 : index
    %77 = vector.load %arg11[%c0_57, %c0_58] : memref<1x160xf32, #tpu.memory_space<vmem>>, vector<1x160xf32>
    %78 = vector.broadcast %77 : vector<1x160xf32> to vector<8x160xf32>
    %79 = arith.addf %76, %78 : vector<8x160xf32>
    %cst_59 = arith.constant 0.000000e+00 : f32
    %80 = vector.broadcast %cst_59 : f32 to vector<8x160xf32>
    %81 = arith.maximumf %79, %80 : vector<8x160xf32>
    %82 = arith.truncf %81 : vector<8x160xf32> to vector<8x160xbf16>
    %c0_60 = arith.constant 0 : index
    %c0_61 = arith.constant 0 : index
    %83 = vector.load %arg12[%c0_60, %c0_61] : memref<160x10xbf16, #tpu.memory_space<vmem>>, vector<160x10xbf16>
    %cst_62 = arith.constant dense<0.000000e+00> : vector<8x10xf32>
    %84 = tpu.matmul %82, %83, %cst_62 {dimension_numbers = #tpu.dot_dimension_numbers<[1], [0], [0], [1], [0, 0, 1, 1], [], []>} : vector<8x160xbf16>, vector<160x10xbf16>, vector<8x10xf32> -> vector<8x10xf32>
    %c0_63 = arith.constant 0 : index
    %c0_64 = arith.constant 0 : index
    %85 = vector.load %arg13[%c0_63, %c0_64] : memref<1x10xf32, #tpu.memory_space<vmem>>, vector<1x10xf32>
    %86 = vector.broadcast %85 : vector<1x10xf32> to vector<8x10xf32>
    %87 = arith.addf %84, %86 : vector<8x10xf32>
    %88 = arith.negf %87 : vector<8x10xf32>
    %89 = math.exp %88 : vector<8x10xf32>
    %cst_65 = arith.constant 1.000000e+00 : f32
    %90 = vector.broadcast %cst_65 : f32 to vector<8x10xf32>
    %91 = arith.addf %90, %89 : vector<8x10xf32>
    %92 = arith.divf %90, %91 : vector<8x10xf32>
    %93 = vector.extract_strided_slice %0 {offsets = [0, 2], sizes = [8, 10], strides = [1, 1]} : vector<8x12xf32> to vector<8x10xf32>
    %94 = arith.cmpf oge, %92, %93 : vector<8x10xf32>
    %95 = arith.extui %94 : vector<8x10xi1> to vector<8x10xi32>
    %96 = arith.sitofp %95 : vector<8x10xi32> to vector<8x10xf32>
    %97 = arith.mulf %65, %96 : vector<8x10xf32>
    %cst_66 = arith.constant dense<0.000000e+00> : vector<8xf32>
    %98 = vector.multi_reduction <add>, %97, %cst_66 [1] : vector<8x10xf32> to vector<8xf32>
    %99 = vector.shape_cast %98 : vector<8xf32> to vector<8x1xf32>
    %100 = arith.addf %29, %99 : vector<8x1xf32>
    %101 = vector.extract_strided_slice %62 {offsets = [0, 96], sizes = [8, 16], strides = [1, 1]} : vector<8x160xf32> to vector<8x16xf32>
    %102 = arith.mulf %101, %101 : vector<8x16xf32>
    %cst_67 = arith.constant dense<0.000000e+00> : vector<8xf32>
    %103 = vector.multi_reduction <add>, %102, %cst_67 [1] : vector<8x16xf32> to vector<8xf32>
    %104 = vector.shape_cast %103 : vector<8xf32> to vector<8x1xf32>
    %c0_68 = arith.constant 0 : index
    %c0_69 = arith.constant 0 : index
    %105 = vector.load %arg20[%c0_68, %c0_69] : memref<8x2xf32, #tpu.memory_space<vmem>>, vector<8x1xf32>
    tpu.vector_store %arg20[%c0_68, %c0_69], %100 {strides = array<i32>} : memref<8x2xf32, #tpu.memory_space<vmem>>, vector<8x1xf32>,
    %106 = arith.addf %25, %104 : vector<8x1xf32>
    %cst_70 = arith.constant 0.00999999977 : f32
    %107 = vector.broadcast %cst_70 : f32 to vector<8x1xf32>
    %108 = arith.mulf %107, %106 : vector<8x1xf32>
    %c0_71 = arith.constant 0 : index
    %c1_72 = arith.constant 1 : index
    %109 = vector.load %arg20[%c0_71, %c1_72] : memref<8x2xf32, #tpu.memory_space<vmem>>, vector<8x1xf32>
    tpu.vector_store %arg20[%c0_71, %c1_72], %108 {strides = array<i32>} : memref<8x2xf32, #tpu.memory_space<vmem>>, vector<8x1xf32>,
    return
  }
  func.func @transform_0(%arg0: i32) -> (i32, i32) {
    %c0_i32 = arith.constant 0 : i32
    %c0_i32_0 = arith.constant 0 : i32
    %c0_i32_1 = arith.constant 0 : i32
    return %c0_i32, %c0_i32_0 : i32, i32
  }
  func.func @transform_1(%arg0: i32) -> (i32, i32) {
    %c0_i32 = arith.constant 0 : i32
    %c0_i32_0 = arith.constant 0 : i32
    return %arg0, %c0_i32 : i32, i32
  }
  func.func @transform_2(%arg0: i32) -> (i32, i32) {
    %c0_i32 = arith.constant 0 : i32
    %c0_i32_0 = arith.constant 0 : i32
    return %arg0, %c0_i32 : i32, i32
  }
  func.func @transform_3(%arg0: i32) -> (i32, i32) {
    %c0_i32 = arith.constant 0 : i32
    %c0_i32_0 = arith.constant 0 : i32
    return %arg0, %c0_i32 : i32, i32
  }
  func.func @transform_4(%arg0: i32) -> (i32, i32, i32) {
    %c0_i32 = arith.constant 0 : i32
    %c0_i32_0 = arith.constant 0 : i32
    %c0_i32_1 = arith.constant 0 : i32
    %c0_i32_2 = arith.constant 0 : i32
    return %c0_i32, %c0_i32_0, %c0_i32_1 : i32, i32, i32
  }
  func.func @transform_5(%arg0: i32) -> (i32, i32, i32) {
    %c0_i32 = arith.constant 0 : i32
    %c0_i32_0 = arith.constant 0 : i32
    %c0_i32_1 = arith.constant 0 : i32
    %c0_i32_2 = arith.constant 0 : i32
    return %c0_i32, %c0_i32_0, %c0_i32_1 : i32, i32, i32
  }
  func.func @transform_6(%arg0: i32) -> (i32, i32) {
    %c0_i32 = arith.constant 0 : i32
    %c0_i32_0 = arith.constant 0 : i32
    %c0_i32_1 = arith.constant 0 : i32
    return %c0_i32, %c0_i32_0 : i32, i32
  }
  func.func @transform_7(%arg0: i32) -> (i32, i32) {
    %c0_i32 = arith.constant 0 : i32
    %c0_i32_0 = arith.constant 0 : i32
    %c0_i32_1 = arith.constant 0 : i32
    return %c0_i32, %c0_i32_0 : i32, i32
  }
  func.func @transform_8(%arg0: i32) -> (i32, i32) {
    %c0_i32 = arith.constant 0 : i32
    %c0_i32_0 = arith.constant 0 : i32
    %c0_i32_1 = arith.constant 0 : i32
    return %c0_i32, %c0_i32_0 : i32, i32
  }
  func.func @transform_9(%arg0: i32) -> (i32, i32) {
    %c0_i32 = arith.constant 0 : i32
    %c0_i32_0 = arith.constant 0 : i32
    %c0_i32_1 = arith.constant 0 : i32
    return %c0_i32, %c0_i32_0 : i32, i32
  }
  func.func @transform_10(%arg0: i32) -> (i32, i32) {
    %c0_i32 = arith.constant 0 : i32
    %c0_i32_0 = arith.constant 0 : i32
    %c0_i32_1 = arith.constant 0 : i32
    return %c0_i32, %c0_i32_0 : i32, i32
  }
  func.func @transform_11(%arg0: i32) -> (i32, i32) {
    %c0_i32 = arith.constant 0 : i32
    %c0_i32_0 = arith.constant 0 : i32
    %c0_i32_1 = arith.constant 0 : i32
    return %c0_i32, %c0_i32_0 : i32, i32
  }
  func.func @transform_12(%arg0: i32) -> (i32, i32) {
    %c0_i32 = arith.constant 0 : i32
    %c0_i32_0 = arith.constant 0 : i32
    %c0_i32_1 = arith.constant 0 : i32
    return %c0_i32, %c0_i32_0 : i32, i32
  }
  func.func @transform_13(%arg0: i32) -> (i32, i32) {
    %c0_i32 = arith.constant 0 : i32
    %c0_i32_0 = arith.constant 0 : i32
    %c0_i32_1 = arith.constant 0 : i32
    return %c0_i32, %c0_i32_0 : i32, i32
  }
  func.func @transform_14(%arg0: i32) -> (i32, i32) {
    %c0_i32 = arith.constant 0 : i32
    %c0_i32_0 = arith.constant 0 : i32
    %c0_i32_1 = arith.constant 0 : i32
    return %c0_i32, %c0_i32_0 : i32, i32
  }
  func.func @transform_15(%arg0: i32) -> (i32, i32) {
    %c0_i32 = arith.constant 0 : i32
    %c0_i32_0 = arith.constant 0 : i32
    %c0_i32_1 = arith.constant 0 : i32
    return %c0_i32, %c0_i32_0 : i32, i32
  }
  func.func @transform_16(%arg0: i32) -> (i32, i32) {
    %c0_i32 = arith.constant 0 : i32
    %c0_i32_0 = arith.constant 0 : i32
    %c0_i32_1 = arith.constant 0 : i32
    return %c0_i32, %c0_i32_0 : i32, i32
  }
  func.func @transform_17(%arg0: i32) -> (i32, i32) {
    %c0_i32 = arith.constant 0 : i32
    %c0_i32_0 = arith.constant 0 : i32
    %c0_i32_1 = arith.constant 0 : i32
    return %c0_i32, %c0_i32_0 : i32, i32
  }
  func.func @transform_18(%arg0: i32) -> (i32, i32) {
    %c0_i32 = arith.constant 0 : i32
    %c0_i32_0 = arith.constant 0 : i32
    %c0_i32_1 = arith.constant 0 : i32
    return %c0_i32, %c0_i32_0 : i32, i32
  }
  func.func @transform_19(%arg0: i32) -> (i32, i32) {
    %c0_i32 = arith.constant 0 : i32
    %c0_i32_0 = arith.constant 0 : i32
    return %arg0, %c0_i32 : i32, i32
  }
}

</mosaic_0001>

<bundles_post_ra>
// kernel: tpu_custom_call.1
= control target key start
LH: loop header
LB: loop body
LE: loop exit
PB: predicated region body
PF: predicated region fallthrough
CT: control target
= control target key end

     0   :  { %vm122_vm0 = vcmask 785408   ;;  %vm177_vm1 = vcmask 523264   ;;  %vm216_vm2 = vcmask 261120   ;;  %s2202_s25 = smov 32   ;;  %vm1485_vm3 = vcmask 130048   ;;  %s3300_s13 = inlined_call_operand.vmem [shape: bf16[96,64], index: 13, kind: input, shape index: {}]   ;;  %s3301_s15 = inlined_call_operand.vmem [shape: bf16[64,32], index: 15, kind: input, shape index: {}]   ;;  %s3302_s14 = inlined_call_operand.vmem [shape: f32[1,64], index: 14, kind: input, shape index: {}]   ;;  %s3303_s2 = inlined_call_operand.vmem [shape: bf16[8,96], index: 2, kind: input, shape index: {}]   ;;  %s3304_s16 = inlined_call_operand.vmem [shape: f32[1,32], index: 16, kind: input, shape index: {}]   ;;  %s3305_s4 = inlined_call_operand.vmem [shape: bf16[3,96,160], index: 4, kind: input, shape index: {}]   ;;  %s3306_s17 = inlined_call_operand.vmem [shape: bf16[32,1], index: 17, kind: input, shape index: {}]   ;;  %s3307_s3 = inlined_call_operand.vmem [shape: bf16[8,96], index: 3, kind: input, shape index: {}]   ;;  %s3308_s6 = inlined_call_operand.vmem [shape: f32[160,10], index: 6, kind: input, shape index: {}]   ;;  %s3309_s18 = inlined_call_operand.<no memory space> [shape: f32[1,1], index: 18, kind: input, shape index: {}]   ;;  %s3310_s5 = inlined_call_operand.vmem [shape: f32[3,1,160], index: 5, kind: input, shape index: {}]   ;;  %s3311_s0 = inlined_call_operand.<no memory space> [shape: f32[1,1], index: 0, kind: input, shape index: {}]   ;;  %s3312_s7 = inlined_call_operand.vmem [shape: bf16[160,320], index: 7, kind: input, shape index: {}]   ;;  %s3313_s1 = inlined_call_operand.vmem [shape: f32[8,12], index: 1, kind: input, shape index: {}]   ;;  %s3314_s9 = inlined_call_operand.vmem [shape: bf16[320,160], index: 9, kind: input, shape index: {}]   ;;  %s3315_s8 = inlined_call_operand.vmem [shape: f32[1,320], index: 8, kind: input, shape index: {}]   ;;  %s3316_s12 = inlined_call_operand.vmem [shape: f32[1,10], index: 12, kind: input, shape index: {}]   ;;  %s3317_s11 = inlined_call_operand.vmem [shape: bf16[160,10], index: 11, kind: input, shape index: {}]   ;;  %s3318_s10 = inlined_call_operand.vmem [shape: f32[1,160], index: 10, kind: input, shape index: {}]   ;;  %s3319_s19 = inlined_call_operand.vmem [shape: f32[8,2], index: 19, kind: output, shape index: {}]  }
   0x1   :  { %3322 = sst [smem:[#allocation4_spill]] %s3300_s13  ;;  %v1592_v11 = vld [vmem:[%s3305_s4 + $0x50] sm:$0xf]  ;;  %v2084_v12 = vld [vmem:[%s3305_s4 + $0x54] sm:$0xf0]  ;;  %v2072_v37 = vld [vmem:[%s3306_s17 + $0x8] sm:$0xff] }
   0x2   :  { %3323 = sst [smem:[#allocation5_spill]] %s3301_s15  ;;  %v1584_v13 = vld [vmem:[%s3305_s4 + $0x40] sm:$0xf]  ;;  %v1593_v14 = vor.u32 %v2084_v12, %v1592_v11  ;;  %v2082_v15 = vld [vmem:[%s3305_s4 + $0x44] sm:$0xf0]  ;;  %226 = vmatpush.bf16.msra.mxu2 %v2072_v37  ;;  %s2201_s13 = smov 126  }
   0x3   :  { %3324 = sst [smem:[#allocation6_spill]] %s3302_s14  ;;  %v2083_v16 = vld [vmem:[%s3305_s4 + $0x54] sm:$0xf]  ;;  %v1585_v17 = vor.u32 %v2082_v15, %v1584_v13  ;;  %v1576_v18 = vld [vmem:[%s3305_s4 + $0x30] sm:$0xf]  ;;  %v2071_v43 = vld [vmem:[%s3306_s17] sm:$0xff] }
   0x4   :  { %3325 = sst [smem:[#allocation7_spill]] %s3303_s2  ;;  %319 = vmatpush.bf16.msra.mxu3 %v1593_v14  ;;  %v1594_v19 = vld [vmem:[%s3305_s4 + $0x58] sm:$0xf0]  ;;  %v2080_v20 = vld [vmem:[%s3305_s4 + $0x34] sm:$0xf0]  ;;  %vm1475_vm9 = vcmask 80896  }
   0x5   :  { %s3326_s20 = sld [smem:[#allocation4_spill]]  ;;  %v1597_v21 = vor.u32 %v2083_v16, %v1594_v19  ;;  %v2081_v22 = vld [vmem:[%s3305_s4 + $0x44] sm:$0xf]  ;;  %v1586_v23 = vld [vmem:[%s3305_s4 + $0x48] sm:$0xf0]  ;;  %v1577_v25 = vor.u32 %v2080_v20, %v1576_v18  ;;  %vm1489_vm10 = vcmask 7168  }
   0x6   :  { %s3327_s23 = sld [smem:[#allocation5_spill]]  ;;  %v1589_v24 = vor.u32 %v2081_v22, %v1586_v23  ;;  %v2079_v26 = vld [vmem:[%s3305_s4 + $0x34] sm:$0xf]  ;;  %v1578_v27 = vld [vmem:[%s3305_s4 + $0x38] sm:$0xf0]  ;;  %227 = vmatpush.bf16.msra.mxu2 %v2071_v43  ;;  %vm1493_vm11 = vcmask 15368  }
   0x7   :  { %s3328_s14 = sld [smem:[#allocation7_spill]]  ;;  %v1568_v28 = vld [vmem:[%s3305_s4 + $0x20] sm:$0xf]  ;;  %v2078_v29 = vld [vmem:[%s3305_s4 + $0x24] sm:$0xf0]  ;;  %v2383_v30 = vor.u32 %v2079_v26, %v1578_v27 }
   0x8   :  { %320 = vmatpush.bf16.msra.mxu3 %v1585_v17  ;;  %v1569_v31 = vor.u32 %v2078_v29, %v1568_v28  ;;  %v2077_v32 = vld [vmem:[%s3305_s4 + $0x24] sm:$0xf]  ;;  %v1570_v33 = vld [vmem:[%s3305_s4 + $0x28] sm:$0xf0]  ;;  %v1560_v34 = vld [vmem:[%s3305_s4 + $0x10] sm:$0xf] }
   0x9   :  { %v2076_v35 = vld [vmem:[%s3305_s4 + $0x14] sm:$0xf0]  ;;  %v2398_v36 = vor.u32 %v2077_v32, %v1570_v33  ;;  %v2075_v39 = vld [vmem:[%s3305_s4 + $0x14] sm:$0xf]  ;;  %v1562_v40 = vld [vmem:[%s3305_s4 + $0x18] sm:$0xf0] }
   0xa   :  { %v1561_v38 = vor.u32 %v2076_v35, %v1560_v34  ;;  %v1552_v41 = vld [vmem:[%s3305_s4] sm:$0xf]  ;;  %v2074_v42 = vld [vmem:[%s3305_s4 + $0x4] sm:$0xf0]  ;;  %v1657_v44 = vld [vmem:[%s3305_s4 + $0xb0] sm:$0xf]  ;;  %v2425_v46 = vor.u32 %v2075_v39, %v1562_v40  ;;  %332 = vmatpush.bf16.msrb.mxu2 %v1597_v21 }
   0xb   :  { %v2066_v0 = vld [vmem:[%s3326_s20 + $0x28] sm:$0xff]  ;;  %v2065_v1 = vld [vmem:[%s3326_s20 + $0x20] sm:$0xff]  ;;  %v2064_v4 = vld [vmem:[%s3326_s20 + $0x18] sm:$0xff]  ;;  %v1553_v47 = vor.u32 %v2074_v42, %v1552_v41  ;;  %s3329_s27 = sld [smem:[#allocation6_spill]] }
   0xc   :  { %128 = vmatpush.bf16.msra.mxu0 %v2066_v0  ;;  %v2070_v2 = vld [vmem:[%s3327_s23 + $0x18] sm:$0xff]  ;;  %v2069_v3 = vld [vmem:[%s3327_s23 + $0x10] sm:$0xff]  ;;  %v2062_v6 = vld [vmem:[%s3326_s20 + $0x8] sm:$0xff]  ;;  %321 = vmatpush.bf16.msra.mxu3 %v1577_v25 }
   0xd   :  { %185 = vmatpush.bf16.msra.mxu1 %v2070_v2  ;;  %v2063_v5 = vld [vmem:[%s3326_s20 + $0x10] sm:$0xff]  ;;  %v2061_v7 = vld [vmem:[%s3326_s20] sm:$0xff]  ;;  %v2068_v9 = vld [vmem:[%s3327_s23 + $0x8] sm:$0xff] }
   0xe   :  { %v2331_v8 = vld [vmem:[%s3328_s14] sm:$0xf]  ;;  %v2096_v45 = vld [vmem:[%s3305_s4 + $0xb4] sm:$0xf0]  ;;  %v2073_v48 = vld [vmem:[%s3305_s4 + $0x4] sm:$0xf]  ;;  %333 = vmatpush.bf16.msrb.mxu2 %v1589_v24 }
   0xf   :  { %v2067_v10 = vld [vmem:[%s3327_s23] sm:$0xff]  ;;  %v1554_v49 = vld [vmem:[%s3305_s4 + $0x8] sm:$0xf0]  ;;  %v1658_v50 = vor.u32 %v2096_v45, %v1657_v44  ;;  %v2095_v51 = vld [vmem:[%s3305_s4 + $0xb4] sm:$0xf] }
  0x10   :  { %129 = vmatpush.bf16.msra.mxu0 %v2065_v1  ;;  %322 = vmatpush.bf16.msra.mxu3 %v1569_v31  ;;  %v1659_v52 = vld [vmem:[%s3305_s4 + $0xb8] sm:$0xf0]  ;;  %v1649_v54 = vld [vmem:[%s3305_s4 + $0xa0] sm:$0xf]  ;;  %v2094_v55 = vld [vmem:[%s3305_s4 + $0xa4] sm:$0xf0]  ;;  %v2449_v56 = vor.u32 %v2073_v48, %v1554_v49 }
  0x11   :  { %186 = vmatpush.bf16.msra.mxu1 %v2069_v3  ;;  %v2192_v53 = vld [vmem:[%s3329_s27] ss:$0 sm:$0xff]  ;;  %v2451_v57 = vor.u32 %v2095_v51, %v1659_v52  ;;  %v1650_v59 = vor.u32 %v2094_v55, %v1649_v54  ;;  %v2093_v60 = vld [vmem:[%s3305_s4 + $0xa4] sm:$0xf]  ;;  %v1651_v61 = vld [vmem:[%s3305_s4 + $0xa8] sm:$0xf0] }
  0x12   :  { %v1641_v63 = vld [vmem:[%s3305_s4 + $0x90] sm:$0xf]  ;;  %v2092_v0 = vld [vmem:[%s3305_s4 + $0x94] sm:$0xf0]  ;;  %v2471_v1 = vld [vmem:[%s3307_s3] sm:$0xf]  ;;  %v2474_v3 = vor.u32 %v2093_v60, %v1651_v61  ;;  %334 = vmatpush.bf16.msrb.mxu2 %v2383_v30 }
  0x13   :  { %v1635_v15 = vld [vmem:[%s3305_s4 + $0x88] sm:$0xf0]  ;;  %v1625_v16 = vld [vmem:[%s3305_s4 + $0x70] sm:$0xf]  ;;  %v2087_v20 = vld [vmem:[%s3305_s4 + $0x74] sm:$0xf] }
  0x14   :  { %130 = vmatpush.bf16.msra.mxu0 %v2064_v4  ;;  %323 = vmatpush.bf16.msra.mxu3 %v1561_v38  ;;  %v1642_v4 = vor.u32 %v2092_v0, %v1641_v63  ;;  %v1617_v22 = vld [vmem:[%s3305_s4 + $0x60] sm:$0xf]  ;;  %v2086_v23 = vld [vmem:[%s3305_s4 + $0x64] sm:$0xf0]  ;;  %v2085_v28 = vld [vmem:[%s3305_s4 + $0x64] sm:$0xf] }
  0x15   :  { %187 = vmatpush.bf16.msra.mxu1 %v2068_v9  ;;  %v1633_v9 = vld [vmem:[%s3305_s4 + $0x80] sm:$0xf]  ;;  %v1618_v27 = vor.u32 %v2086_v23, %v1617_v22  ;;  %v1619_v29 = vld [vmem:[%s3305_s4 + $0x68] sm:$0xf0]  ;;  %v1724_v32 = vld [vmem:[%s3305_s4 + $0x118] sm:$0xf0] }
  0x16   :  { %335 = vmatpush.bf16.msrb.mxu2 %v2398_v36  ;;  %v1714_v33 = vld [vmem:[%s3305_s4 + $0x100] sm:$0xf]  ;;  %v2106_v34 = vld [vmem:[%s3305_s4 + $0x104] sm:$0xf0]  ;;  %v2553_v35 = vor.u32 %v2085_v28, %v1619_v29  ;;  %v2104_v39 = vld [vmem:[%s3305_s4 + $0xf4] sm:$0xf0] }
  0x17   :  { %v1715_v37 = vor.u32 %v2106_v34, %v1714_v33  ;;  %v1698_v41 = vld [vmem:[%s3305_s4 + $0xe0] sm:$0xf]  ;;  %v2102_v42 = vld [vmem:[%s3305_s4 + $0xe4] sm:$0xf0]  ;;  %v1690_v44 = vld [vmem:[%s3305_s4 + $0xd0] sm:$0xf] }
  0x18   :  { %131 = vmatpush.bf16.msra.mxu0 %v2063_v5  ;;  %324 = vmatpush.bf16.msra.mxu3 %v1553_v47  ;;  %v2091_v5 = vld [vmem:[%s3305_s4 + $0x94] sm:$0xf]  ;;  %v1699_v43 = vor.u32 %v2102_v42, %v1698_v41  ;;  %v2100_v45 = vld [vmem:[%s3305_s4 + $0xd4] sm:$0xf0]  ;;  %v1716_v48 = vld [vmem:[%s3305_s4 + $0x108] sm:$0xf0] }
  0x19   :  { %188 = vmatpush.bf16.msra.mxu1 %v2067_v10  ;;  %v2090_v10 = vld [vmem:[%s3305_s4 + $0x84] sm:$0xf0]  ;;  %v2103_v52 = vld [vmem:[%s3305_s4 + $0xf4] sm:$0xf]  ;;  %v1708_v54 = vld [vmem:[%s3305_s4 + $0xf8] sm:$0xf0] }
  0x1a   :  { %v1634_v13 = vor.u32 %v2090_v10, %v1633_v9  ;;  %336 = vmatpush.bf16.msrb.mxu2 %v2425_v46  ;;  %v2098_v51 = vld [vmem:[%s3305_s4 + $0xc4] sm:$0xf0]  ;;  %v2606_v55 = vor.u32 %v2103_v52, %v1708_v54  ;;  %v2099_v60 = vld [vmem:[%s3305_s4 + $0xd4] sm:$0xf]  ;;  %v1692_v61 = vld [vmem:[%s3305_s4 + $0xd8] sm:$0xf0] }
  0x1b   :  { %1598 = vmatmul.msk.bf16.vlgmr.msra.gmra.mxu3 %vm122_vm0, %v2331_v8  ;;  %v2097_v63 = vld [vmem:[%s3305_s4 + $0xc4] sm:$0xf]  ;;  %v1684_v0 = vld [vmem:[%s3305_s4 + $0xc8] sm:$0xf0]  ;;  %v2687_v22 = vld [vmem:[%s3310_s5 + $0x2] sm:$0x3] }
  0x1c   :  { %132 = vmatpush.bf16.msra.mxu0 %v2062_v6  ;;  %454 = vmatpush.bf16.msrb.mxu3 %v1658_v50  ;;  %v1643_v6 = vld [vmem:[%s3305_s4 + $0x98] sm:$0xf0]  ;;  %v653_v23 = vld [vmem:[%s3308_s6 + $0x48] sm:$0xff]  ;;  %v389_v28 = vperm.slane %v2687_v22, 1  ;;  %v650_v34 = vld [vmem:[%s3308_s6 + $0x30] sm:$0xff] }
  0x1d   :  { %348 = vmatpush.bf16.msrb.mxu1 %v1593_v14  ;;  %v2493_v11 = vor.u32 %v2091_v5, %v1643_v6  ;;  %v2089_v14 = vld [vmem:[%s3305_s4 + $0x84] sm:$0xf]  ;;  %v651_v29 = vld [vmem:[%s3308_s6 + $0x38] sm:$0xff] }
  0x1e   :  { %v2509_v18 = vor.u32 %v2089_v14, %v1635_v15  ;;  %337 = vmatpush.bf16.msrb.mxu2 %v2449_v56  ;;  %v658_v14 = vld [vmem:[%s3308_s6 + $0x70] sm:$0xff]  ;;  %v656_v15 = vld [vmem:[%s3308_s6 + $0x60] sm:$0xff]  ;;  %v647_v41 = vld [vmem:[%s3308_s6 + $0x18] sm:$0xff] }
  0x1f   :  { %v644_v52 = vld [vmem:[%s3308_s6] sm:$0xff] }
  0x20   :  { %133 = vmatpush.bf16.msra.mxu0 %v2061_v7  ;;  %455 = vmatpush.bf16.msrb.mxu3 %v1650_v59 }
  0x21   :  { %349 = vmatpush.bf16.msrb.mxu1 %v1585_v17  ;;  %v2088_v17 = vld [vmem:[%s3305_s4 + $0x74] sm:$0xf0] }
  0x22   :  { %v1626_v19 = vor.u32 %v2088_v17, %v1625_v16  ;;  %v655_v16 = vld [vmem:[%s3308_s6 + $0x58] sm:$0xff]  ;;  %v2678_v17 = vld [vmem:[%s3310_s5] sm:$0x3] }
  0x23   :  { %1523 = vmatmul.msk.bf16.vlgmr.msra.gmra.mxu0 %vm122_vm0, %v2331_v8 }
  0x24   :  { %361 = vmatpush.bf16.msrb.mxu0 %v1597_v21  ;;  %456 = vmatpush.bf16.msrb.mxu3 %v1642_v4  ;;  %v1627_v21 = vld [vmem:[%s3305_s4 + $0x78] sm:$0xf0] }
  0x25   :  { %350 = vmatpush.bf16.msrb.mxu1 %v1577_v25  ;;  %v2108_v25 = vld [vmem:[%s3305_s4 + $0x114] sm:$0xf0]  ;;  %v2531_v26 = vor.u32 %v2087_v20, %v1627_v21  ;;  %v654_v20 = vld [vmem:[%s3308_s6 + $0x50] sm:$0xff] }
  0x28   :  { %362 = vmatpush.bf16.msrb.mxu0 %v1589_v24  ;;  %457 = vmatpush.bf16.msrb.mxu3 %v1634_v13  ;;  %v1722_v24 = vld [vmem:[%s3305_s4 + $0x110] sm:$0xf] }
  0x29   :  { %351 = vmatpush.bf16.msrb.mxu1 %v1569_v31  ;;  %v2107_v31 = vld [vmem:[%s3305_s4 + $0x114] sm:$0xf] }
  0x2c   :  { %363 = vmatpush.bf16.msrb.mxu0 %v2383_v30  ;;  %458 = vmatpush.bf16.msrb.mxu3 %v1626_v19  ;;  %v1723_v30 = vor.u32 %v2108_v25, %v1722_v24  ;;  %v253_v24 = vperm.slane %v2678_v17, 0  ;;  %v254_v25 = vperm.slane %v2678_v17, 1  ;;  %v1815_v17 = vld [vmem:[%s3312_s7 + $0x98] sm:$0xf] }
  0x2d   :  { %352 = vmatpush.bf16.msrb.mxu1 %v1561_v38  ;;  %v1706_v38 = vld [vmem:[%s3305_s4 + $0xf0] sm:$0xf] }
  0x2e   :  { %v1707_v40 = vor.u32 %v2104_v39, %v1706_v38 }
  0x30   :  { %364 = vmatpush.bf16.msrb.mxu0 %v2398_v36  ;;  %459 = vmatpush.bf16.msrb.mxu3 %v1618_v27  ;;  %v2555_v36 = vor.u32 %v2107_v31, %v1724_v32 }
  0x31   :  { %353 = vmatpush.bf16.msrb.mxu1 %v1553_v47  ;;  %v1691_v47 = vor.u32 %v2100_v45, %v1690_v44  ;;  %v24_v44 = vstv %s3311_s0  ;;  %v2736_v45 = vld [vmem:[%s3310_s5 + $0x4] sm:$0x3] }
  0x32   :  { %25 = vst [vmem:[#allocation2] sm:$0x1] %v24_v44 }
  0x33   :  { %1663 = vmatmul.msk.bf16.vlgmr.msrb.gmra.mxu3 %vm122_vm0, %v2331_v8 }
  0x34   :  { %365 = vmatpush.bf16.msrb.mxu0 %v2425_v46  ;;  %590 = vmatpush.bf16.msra.mxu3 %v1723_v30  ;;  %v2105_v46 = vld [vmem:[%s3305_s4 + $0x104] sm:$0xf] }
  0x35   :  { %v2591_v49 = vor.u32 %v2105_v46, %v1716_v48  ;;  %v524_v46 = vperm.slane %v2736_v45, 0  ;;  %v1821_v48 = vld [vmem:[%s3312_s7 + $0xb4] sm:$0xf0] }
  0x38   :  { %366 = vmatpush.bf16.msrb.mxu0 %v2449_v56  ;;  %591 = vmatpush.bf16.msra.mxu3 %v1715_v37  ;;  %v2101_v56 = vld [vmem:[%s3305_s4 + $0xe4] sm:$0xf] }
  0x3b   :  { %1601 = vmatmul.msk.bf16.vlgmr.msrb.gmra.mxu0 %vm122_vm0, %v2471_v1 }
  0x3c   :  { %493 = vmatpush.bf16.msra.mxu0 %v2451_v57  ;;  %592 = vmatpush.bf16.msra.mxu3 %v1707_v40 }
  0x40   :  { %494 = vmatpush.bf16.msra.mxu0 %v2474_v3  ;;  %593 = vmatpush.bf16.msra.mxu3 %v1699_v43 }
  0x44   :  { %495 = vmatpush.bf16.msra.mxu0 %v2493_v11  ;;  %594 = vmatpush.bf16.msra.mxu3 %v1691_v47 }
  0x48   :  { %496 = vmatpush.bf16.msra.mxu0 %v2509_v18 }
  0x4c   :  { %497 = vmatpush.bf16.msra.mxu0 %v2531_v26 }
  0x50   :  { %498 = vmatpush.bf16.msra.mxu0 %v2553_v35 }
  0x53   :  { %1666 = vmatmul.msk.bf16.vlgmr.msra.gmra.mxu0 %vm122_vm0, %v2471_v1 }
  0x54   :  { %629 = vmatpush.bf16.msrb.mxu0 %v2555_v36 }
  0x58   :  { %630 = vmatpush.bf16.msrb.mxu0 %v2591_v49 }
  0x5c   :  { %631 = vmatpush.bf16.msrb.mxu0 %v2606_v55 }
  0xa0   :  { %v135_v58 = vpop.f32.mrf.mxu0 }
  0xa1   :  { %v136_v62 = vadd.f32 %v2192_v53, %v135_v58  ;;  %v1700_v58 = vld [vmem:[%s3305_s4 + $0xe8] sm:$0xf0] }
  0xa3   :  { %v139_v2 = vmax.f32 %v136_v62, 0.0  ;;  %v2628_v62 = vor.u32 %v2099_v60, %v1692_v61  ;;  %v2771_v61 = vld [vmem:[%s3313_s1] sm:$0xff] }
  0xa4   :  { %1468 = vrot.lane.b32.xlu0 %v2771_v61, %s2201_s13 }
  0xa5   :  { %v140_v7 = vpack.c.bf16 %v139_v2, %v139_v2  ;;  %v2637_v2 = vor.u32 %v2097_v63, %v1684_v0  ;;  %v525_v63 = vperm.slane %v2736_v45, 1  ;;  %v2126_v45 = vld [vmem:[%s3312_s7 + $0x88] sm:$0xf0] }
  0xa7   :  { %1540 = vmatmul.msk.bf16.vlgmr.msra.gmra.mxu1 %vm177_vm1, %v140_v7 }
  0xa8   :  { %v137_v12 = vpop.f32.mrf.mxu0  ;;  %480 = vmatpush.bf16.msra.mxu1 %v1658_v50  ;;  %v1682_v50 = vld [vmem:[%s3305_s4 + $0xc0] sm:$0xf] }
  0xa9   :  { %v1683_v53 = vor.u32 %v2098_v51, %v1682_v50  ;;  %v645_v50 = vld [vmem:[%s3308_s6 + $0x8] sm:$0xff] }
  0xab   :  { %595 = vmatpush.bf16.msra.mxu3 %v1683_v53 }
  0xac   :  { %481 = vmatpush.bf16.msra.mxu1 %v1650_v59  ;;  %v2615_v59 = vor.u32 %v2101_v56, %v1700_v58  ;;  %v2136_v56 = vld [vmem:[%s3312_s7 + $0xdc] sm:$0xf]  ;;  %v1845_v58 = vld [vmem:[%s3312_s7 + $0xe4] sm:$0xf0] }
  0xad   :  { %v1848_v60 = vor.u32 %v2136_v56, %v1845_v58 }
  0xae   :  { %1728 = vmatmul.msk.bf16.vlgmr.msra.gmra.mxu3 %vm122_vm0, %v2331_v8  ;;  %632 = vmatpush.bf16.msrb.mxu0 %v2615_v59 }
  0xb0   :  { %482 = vmatpush.bf16.msra.mxu1 %v1642_v4  ;;  %v2193_v4 = vld [vmem:[%s3304_s16] ss:$0 sm:$0xff] }
  0xb2   :  { %633 = vmatpush.bf16.msrb.mxu0 %v2628_v62 }
  0xb4   :  { %483 = vmatpush.bf16.msra.mxu1 %v1634_v13  ;;  %v659_v13 = vld [vmem:[%s3308_s6 + $0x78] sm:$0xff] }
  0xb5   :  { %667 = vmatpush.msrb.mxu3 %v659_v13 }
  0xb6   :  { %634 = vmatpush.bf16.msrb.mxu0 %v2637_v2 }
  0xb7   :  { %1600 = vmatmul.msk.bf16.vlgmr.msrb.gmra.mxu1 %vm122_vm0, %v2471_v1  ;;  %668 = vmatpush.msrb.mxu3 %v658_v14 }
  0xb8   :  { %484 = vmatpush.bf16.msra.mxu1 %v1626_v19  ;;  %v368_v12 = vpop.f32.mrf.mxu0 }
  0xb9   :  { %1731 = vmatmul.msk.bf16.vlgmr.msrb.gmra.mxu0 %vm122_vm0, %v2471_v1  ;;  %v369_v31 = vadd.f32 %v368_v12, %v254_v25  ;;  %v2131_v12 = vld [vmem:[%s3312_s7 + $0xb0] sm:$0xf0] }
  0xbc   :  { %485 = vmatpush.bf16.msra.mxu1 %v1618_v27  ;;  %v388_v27 = vperm.slane %v2687_v22, 0  ;;  %v2129_v22 = vld [vmem:[%s3312_s7 + $0xa0] sm:$0xf0] }
  0xc0   :  { %616 = vmatpush.bf16.msrb.mxu1 %v1723_v30  ;;  %v370_v19 = vpop.f32.mrf.mxu0 }
  0xc4   :  { %617 = vmatpush.bf16.msrb.mxu1 %v1715_v37  ;;  %v649_v37 = vld [vmem:[%s3308_s6 + $0x28] sm:$0xff] }
  0xc7   :  { %1665 = vmatmul.msk.bf16.vlgmr.msra.gmra.mxu1 %vm122_vm0, %v2471_v1 }
  0xc8   :  { %618 = vmatpush.bf16.msrb.mxu1 %v1707_v40  ;;  %v648_v40 = vld [vmem:[%s3308_s6 + $0x20] sm:$0xff] }
  0xcc   :  { %619 = vmatpush.bf16.msrb.mxu1 %v1699_v43 }
  0xd0   :  { %620 = vmatpush.bf16.msrb.mxu1 %v1691_v47  ;;  %v500_v33 = vpop.f32.mrf.mxu0  ;;  %v646_v47 = vld [vmem:[%s3308_s6 + $0x10] sm:$0xff] }
  0xd4   :  { %621 = vmatpush.bf16.msrb.mxu1 %v1683_v53  ;;  %v2127_v53 = vld [vmem:[%s3312_s7 + $0x94] sm:$0xf] }
  0xd7   :  { %1730 = vmatmul.msk.bf16.vlgmr.msrb.gmra.mxu1 %vm122_vm0, %v2471_v1  ;;  %v326_v1 = vpop.f32.mrf.mxu3 }
  0xd8   :  { %v327_v30 = vadd.f32 %v326_v1, %v253_v24  ;;  %v502_v43 = vpop.f32.mrf.mxu0  ;;  %v1819_v1 = vld [vmem:[%s3312_s7 + $0xa8] sm:$0xf] }
 0x124   :  { %v190_v5 = vpop.f32.mrf.mxu1 }
 0x125   :  { %v191_v6 = vadd.f32 %v2193_v4, %v190_v5  ;;  %v2124_v4 = vld [vmem:[%s3312_s7 + $0x7c] sm:$0xf]  ;;  %v1797_v5 = vld [vmem:[%s3312_s7 + $0x84] sm:$0xf0] }
 0x127   :  { %v194_v7 = vmax.f32 %v191_v6, 0.0  ;;  %v2133_v6 = vld [vmem:[%s3312_s7 + $0xc4] sm:$0xf] }
 0x129   :  { %v195_v9 = vpack.c.bf16 %v194_v7, %v194_v7 }
 0x12b   :  { %1549 = vmatmul.msk.bf16.vlgmr.msra.gmra.mxu2 %vm216_vm2, %v195_v9  ;;  %v1800_v9 = vor.u32 %v2124_v4, %v1797_v5  ;;  %v1759_v5 = vld [vmem:[%s3312_s7 + $0x30] sm:$0xf] }
 0x12c   :  { %v192_v10 = vpop.f32.mrf.mxu1  ;;  %467 = vmatpush.bf16.msra.mxu2 %v2451_v57  ;;  %v26_v57 = vstv %s3309_s18 }
 0x12d   :  { %27 = vst [vmem:[#allocation3] sm:$0x1] %v26_v57  ;;  %v1833_v10 = vld [vmem:[%s3312_s7 + $0xcc] sm:$0xf0]  ;;  %v1820_v57 = vor.u32 %v2131_v12, %v1819_v1  ;;  %v2113_v1 = vld [vmem:[%s3312_s7 + $0x20] sm:$0xf0] }
 0x12e   :  { %v1836_v14 = vor.u32 %v2133_v6, %v1833_v10  ;;  %v2116_v6 = vld [vmem:[%s3312_s7 + $0x38] sm:$0xf0] }
 0x12f   :  { %920 = vmatpush.bf16.msra.mxu1 %v1820_v57  ;;  %v663_v10 = vld [vmem:[%s3308_s6 + $0x98] sm:$0xff]  ;;  %v1735_v57 = vld [vmem:[%s3312_s7] sm:$0xf] }
 0x130   :  { %468 = vmatpush.bf16.msra.mxu2 %v2474_v3 }
 0x134   :  { %469 = vmatpush.bf16.msra.mxu2 %v2493_v11  ;;  %v2662_v3 = vpop.f32.mrf.mxu1  ;;  %v657_v11 = vld [vmem:[%s3308_s6 + $0x68] sm:$0xff] }
 0x135   :  { %669 = vmatpush.msrb.mxu3 %v657_v11  ;;  %v2121_v11 = vld [vmem:[%s3312_s7 + $0x64] sm:$0xf] }
 0x136   :  { %v636_v0 = vpop.f32.mrf.mxu0 }
 0x137   :  { %670 = vmatpush.msrb.mxu3 %v656_v15  ;;  %v637_v7 = vadd.f32 %v636_v0, %v525_v63  ;;  %v1785_v15 = vld [vmem:[%s3312_s7 + $0x6c] sm:$0xf0] }
 0x138   :  { %470 = vmatpush.bf16.msra.mxu2 %v2509_v18  ;;  %v328_v18 = vpop.f32.mrf.mxu3 }
 0x139   :  { %671 = vmatpush.msrb.mxu3 %v655_v16  ;;  %v1788_v18 = vor.u32 %v2121_v11, %v1785_v15  ;;  %v2110_v11 = vld [vmem:[%s3312_s7 + $0x8] sm:$0xf0] }
 0x13a   :  { %v1736_v15 = vor.u32 %v2110_v11, %v1735_v57 }
 0x13b   :  { %1599 = vmatmul.msk.bf16.vlgmr.msrb.gmra.mxu2 %vm122_vm0, %v2331_v8  ;;  %672 = vmatpush.msrb.mxu3 %v654_v20 }
 0x13c   :  { %471 = vmatpush.bf16.msra.mxu2 %v2531_v26  ;;  %v357_v21 = vpop.f32.mrf.mxu1  ;;  %v652_v26 = vld [vmem:[%s3308_s6 + $0x40] sm:$0xff] }
 0x13d   :  { %673 = vmatpush.msrb.mxu3 %v653_v23  ;;  %v1807_v21 = vld [vmem:[%s3312_s7 + $0x90] sm:$0xf]  ;;  %v2128_v23 = vld [vmem:[%s3312_s7 + $0x98] sm:$0xf0] }
 0x13f   :  { %674 = vmatpush.msrb.mxu3 %v652_v26  ;;  %v2118_v26 = vld [vmem:[%s3312_s7 + $0x4c] sm:$0xf] }
 0x140   :  { %472 = vmatpush.bf16.msra.mxu2 %v2553_v35  ;;  %v461_v32 = vpop.f32.mrf.mxu3 }
 0x141   :  { %v462_v35 = vadd.f32 %v461_v32, %v388_v27  ;;  %675 = vmatpush.msrb.mxu3 %v651_v29  ;;  %v638_v29 = vpop.f32.mrf.mxu0  ;;  %v1795_v32 = vld [vmem:[%s3312_s7 + $0x78] sm:$0xf] }
 0x142   :  { %v1831_v29 = vld [vmem:[%s3312_s7 + $0xc0] sm:$0xf] }
 0x143   :  { %v504_v38 = vmul.f32 %v462_v35, %v327_v30  ;;  %676 = vmatpush.msrb.mxu3 %v650_v34  ;;  %v1808_v30 = vor.u32 %v2128_v23, %v1807_v21  ;;  %v2115_v35 = vld [vmem:[%s3312_s7 + $0x34] sm:$0xf]  ;;  %v2137_v21 = vld [vmem:[%s3312_s7 + $0xe0] sm:$0xf0] }
 0x144   :  { %603 = vmatpush.bf16.msrb.mxu2 %v2555_v36  ;;  %v501_v36 = vadd.f32 %v500_v33, %v389_v28  ;;  %v2125_v33 = vld [vmem:[%s3312_s7 + $0x80] sm:$0xf0] }
 0x145   :  { %677 = vmatpush.msrb.mxu3 %v649_v37  ;;  %v1851_v37 = vld [vmem:[%s3312_s7 + $0xe0] sm:$0xf]  ;;  %921 = vmatpush.bf16.msra.mxu1 %v1808_v30  ;;  %v2134_v30 = vld [vmem:[%s3312_s7 + $0xc8] sm:$0xf0] }
 0x146   :  { %v507_v39 = vmul.f32 %v501_v36, %v369_v31  ;;  %v1773_v31 = vld [vmem:[%s3312_s7 + $0x54] sm:$0xf0]  ;;  %v1761_v36 = vld [vmem:[%s3312_s7 + $0x3c] sm:$0xf0] }
 0x147   :  { %678 = vmatpush.msrb.mxu3 %v648_v40  ;;  %v1776_v34 = vor.u32 %v2118_v26, %v1773_v31  ;;  %v1796_v40 = vor.u32 %v2125_v33, %v1795_v32  ;;  %v1832_v31 = vor.u32 %v2134_v30, %v1831_v29 }
 0x148   :  { %604 = vmatpush.bf16.msrb.mxu2 %v2591_v49  ;;  %v463_v42 = vpop.f32.mrf.mxu3  ;;  %v643_v16 = vmul.f32 %v637_v7, %v507_v39 }
 0x149   :  { %679 = vmatpush.msrb.mxu3 %v647_v41  ;;  %v2138_v41 = vld [vmem:[%s3312_s7 + $0xe8] sm:$0xf0]  ;;  %v1764_v42 = vor.u32 %v2115_v35, %v1761_v36  ;;  %922 = vmatpush.bf16.msra.mxu1 %v1796_v40 }
 0x14a   :  { %v2804_v19 = vpack.c.bf16 %v643_v16, %v643_v16  ;;  %v1852_v43 = vor.u32 %v2138_v41, %v1851_v37  ;;  %v661_v16 = vld [vmem:[%s3308_s6 + $0x88] sm:$0xff]  ;;  %v1827_v37 = vld [vmem:[%s3312_s7 + $0xb0] sm:$0xf] }
 0x14b   :  { %1664 = vmatmul.msk.bf16.vlgmr.msra.gmra.mxu2 %vm122_vm0, %v2331_v8  ;;  %680 = vmatpush.msrb.mxu3 %v646_v47 }
 0x14c   :  { %605 = vmatpush.bf16.msrb.mxu2 %v2606_v55  ;;  %v1809_v55 = vld [vmem:[%s3312_s7 + $0x9c] sm:$0xf0] }
 0x14d   :  { %681 = vmatpush.msrb.mxu3 %v645_v50  ;;  %v1839_v50 = vld [vmem:[%s3312_s7 + $0xc8] sm:$0xf] }
 0x14f   :  { %682 = vmatpush.msrb.mxu3 %v644_v52 }
 0x150   :  { %606 = vmatpush.bf16.msrb.mxu2 %v2615_v59  ;;  %v597_v49 = vpop.f32.mrf.mxu3  ;;  %v1812_v59 = vor.u32 %v2127_v53, %v1809_v55  ;;  %v2109_v55 = vld [vmem:[%s3312_s7 + $0x4] sm:$0xf] }
 0x151   :  { %v598_v54 = vadd.f32 %v597_v49, %v524_v46  ;;  %965 = vmatpush.bf16.msra.mxu3 %v1848_v60  ;;  %v1749_v49 = vld [vmem:[%s3312_s7 + $0x24] sm:$0xf0] }
 0x154   :  { %607 = vmatpush.bf16.msrb.mxu2 %v2628_v62  ;;  %v2773_v62 = vmul.f32 %v598_v54, %v504_v38  ;;  %v356_v38 = vadd.f32 %v2662_v3, %v253_v24  ;;  %v1783_v3 = vld [vmem:[%s3312_s7 + $0x60] sm:$0xf]  ;;  %v2122_v24 = vld [vmem:[%s3312_s7 + $0x68] sm:$0xf0]  ;;  %v1771_v54 = vld [vmem:[%s3312_s7 + $0x48] sm:$0xf] }
 0x155   :  { %966 = vmatpush.bf16.msra.mxu3 %v1836_v14  ;;  %v662_v14 = vld [vmem:[%s3308_s6 + $0x90] sm:$0xff] }
 0x156   :  { %683 = vmatmul.f32.vlgmr.msrb.gmra.mxu3 %v2773_v62  ;;  %v1480_v4 = vmul.f32 %v2773_v62, %v2773_v62  ;;  %v1747_v62 = vld [vmem:[%s3312_s7 + $0x18] sm:$0xf] }
 0x157   :  { %v1748_v12 = vor.u32 %v2113_v1, %v1747_v62  ;;  %v2164_v62 = vld [vmem:[%s3314_s9 + $0xc4] sm:$0xf0] }
 0x158   :  { %608 = vmatpush.bf16.msrb.mxu2 %v2637_v2  ;;  %v487_v2 = vpop.f32.mrf.mxu1  ;;  %v599_v13 = vpop.f32.mrf.mxu3  ;;  %1482 = vrot.lane.b32.xlu0 %v1480_v4, %s2202_s25 }
 0x159   :  { %v488_v39 = vadd.f32 %v487_v2, %v388_v27  ;;  %991 = vmatpush.bf16.msrb.mxu3 %v1852_v43  ;;  %v2112_v27 = vld [vmem:[%s3312_s7 + $0x1c] sm:$0xf] }
 0x15a   :  { %v1752_v52 = vor.u32 %v2112_v27, %v1749_v49  ;;  %v1779_v27 = vld [vmem:[%s3312_s7 + $0x50] sm:$0xf]  ;;  %v1767_v49 = vld [vmem:[%s3312_s7 + $0x38] sm:$0xf] }
 0x15b   :  { %1729 = vmatmul.msk.bf16.vlgmr.msrb.gmra.mxu2 %vm122_vm0, %v2331_v8  ;;  %v2130_v8 = vld [vmem:[%s3312_s7 + $0xac] sm:$0xf]  ;;  %v506_v44 = vmul.f32 %v488_v39, %v356_v38  ;;  %v2132_v38 = vld [vmem:[%s3312_s7 + $0xb8] sm:$0xf0] }
 0x15c   :  { %v1824_v51 = vor.u32 %v2130_v8, %v1821_v48  ;;  %v1784_v48 = vor.u32 %v2122_v24, %v1783_v3  ;;  %699 = vmatpush.msra.mxu2 %v663_v10  ;;  %v2123_v3 = vld [vmem:[%s3312_s7 + $0x70] sm:$0xf0]  ;;  %v1954_v10 = vld [vmem:[%s3314_s9 + $0xc0] sm:$0xf] }
 0x15d   :  { %v1955_v1 = vor.u32 %v2164_v62, %v1954_v10  ;;  %v1874_v62 = vld [vmem:[%s3314_s9 + $0x20] sm:$0xf] }
 0x15e   :  { %946 = vmatpush.bf16.msra.mxu0 %v1824_v51  ;;  %1854 = vmatmul.msk.bf16.vlgmr.msra.gmra.mxu3 %vm216_vm2, %v2804_v19  ;;  %v2135_v51 = vld [vmem:[%s3312_s7 + $0xd0] sm:$0xf0] }
 0x15f   :  { %v1840_v53 = vor.u32 %v2135_v51, %v1839_v50  ;;  %923 = vmatpush.bf16.msra.mxu1 %v1784_v48  ;;  %700 = vmatpush.msra.mxu2 %v662_v14  ;;  %v1755_v51 = vld [vmem:[%s3312_s7 + $0x20] sm:$0xf] }
 0x160   :  { %v489_v20 = vpop.f32.mrf.mxu1  ;;  %v1938_v14 = vld [vmem:[%s3314_s9 + $0xa0] sm:$0xf] }
 0x161   :  { %992 = vmatpush.bf16.msrb.mxu3 %v1840_v53  ;;  %701 = vmatpush.msra.mxu2 %v661_v16  ;;  %v1843_v20 = vld [vmem:[%s3312_s7 + $0xd8] sm:$0xf]  ;;  %v1978_v53 = vld [vmem:[%s3314_s9 + $0xf0] sm:$0xf] }
 0x162   :  { %947 = vmatpush.bf16.msra.mxu0 %v1812_v59  ;;  %v1737_v59 = vld [vmem:[%s3312_s7 + $0xc] sm:$0xf0]  ;;  %v1844_v23 = vor.u32 %v2137_v21, %v1843_v20  ;;  %v2158_v16 = vld [vmem:[%s3314_s9 + $0x94] sm:$0xf0]  ;;  %v2156_v21 = vld [vmem:[%s3314_s9 + $0x84] sm:$0xf0] }
 0x163   :  { %v1740_v60 = vor.u32 %v2109_v55, %v1737_v59  ;;  %v1743_v59 = vld [vmem:[%s3312_s7 + $0x8] sm:$0xf] }
 0x166   :  { %948 = vmatpush.bf16.msra.mxu0 %v1800_v9  ;;  %v1760_v9 = vor.u32 %v2116_v6, %v1759_v5  ;;  %v1962_v6 = vld [vmem:[%s3314_s9 + $0xd0] sm:$0xf] }
 0x168   :  { %v623_v47 = vpop.f32.mrf.mxu1 }
 0x169   :  { %v624_v8 = vadd.f32 %v623_v47, %v524_v46  ;;  %v2119_v46 = vld [vmem:[%s3312_s7 + $0x50] sm:$0xf0]  ;;  %v1791_v47 = vld [vmem:[%s3312_s7 + $0x68] sm:$0xf] }
 0x16a   :  { %949 = vmatpush.bf16.msra.mxu0 %v1788_v18  ;;  %v1772_v58 = vor.u32 %v2119_v46, %v1771_v54  ;;  %v660_v18 = vld [vmem:[%s3308_s6 + $0x80] sm:$0xff]  ;;  %v1792_v24 = vor.u32 %v2123_v3, %v1791_v47  ;;  %v2170_v54 = vld [vmem:[%s3314_s9 + $0xf4] sm:$0xf0] }
 0x16b   :  { %v642_v56 = vmul.f32 %v624_v8, %v506_v44  ;;  %702 = vmatpush.msra.mxu2 %v660_v18  ;;  %v2120_v8 = vld [vmem:[%s3312_s7 + $0x58] sm:$0xf0]  ;;  %v1970_v46 = vld [vmem:[%s3314_s9 + $0xe0] sm:$0xf]  ;;  %v2147_v47 = vld [vmem:[%s3314_s9 + $0x44] sm:$0xf] }
 0x16c   :  { %924 = vmatpush.bf16.msra.mxu1 %v1772_v58  ;;  %v1780_v48 = vor.u32 %v2120_v8, %v1779_v27  ;;  %v2168_v58 = vld [vmem:[%s3314_s9 + $0xe4] sm:$0xf0]  ;;  %v1922_v18 = vld [vmem:[%s3314_s9 + $0x80] sm:$0xf]  ;;  %v1892_v27 = vld [vmem:[%s3314_s9 + $0x48] sm:$0xf0] }
 0x16d   :  { %v2875_v0 = vpack.c.bf16 %v642_v56, %v642_v56  ;;  %939 = vmatpush.bf16.msrb.mxu2 %v1844_v23  ;;  %v1979_v56 = vor.u32 %v2170_v54, %v1978_v53  ;;  %v1971_v4 = vor.u32 %v2168_v58, %v1970_v46  ;;  %v1914_v23 = vld [vmem:[%s3314_s9 + $0x70] sm:$0xf] }
 0x16e   :  { %950 = vmatpush.bf16.msra.mxu0 %v1776_v34  ;;  %1855 = vmatmul.msk.bf16.vlgmr.msrb.gmra.mxu3 %vm216_vm2, %v2804_v19 }
 0x170   :  { %v625_v7 = vpop.f32.mrf.mxu1  ;;  %925 = vmatpush.bf16.msra.mxu1 %v1760_v9 }
 0x171   :  { %940 = vmatpush.bf16.msrb.mxu2 %v1832_v31  ;;  %v2166_v7 = vld [vmem:[%s3314_s9 + $0xd4] sm:$0xf0]  ;;  %v2153_v31 = vld [vmem:[%s3314_s9 + $0x74] sm:$0xf] }
 0x172   :  { %951 = vmatpush.bf16.msra.mxu0 %v1764_v42  ;;  %v1828_v42 = vor.u32 %v2132_v38, %v1827_v37  ;;  %v1963_v9 = vor.u32 %v2166_v7, %v1962_v6  ;;  %v2152_v37 = vld [vmem:[%s3314_s9 + $0x64] sm:$0xf0]  ;;  %v2151_v38 = vld [vmem:[%s3314_s9 + $0x64] sm:$0xf]  ;;  %v2145_v6 = vld [vmem:[%s3314_s9 + $0x34] sm:$0xf] }
 0x174   :  { %926 = vmatpush.bf16.msra.mxu1 %v1748_v12  ;;  %v1946_v12 = vld [vmem:[%s3314_s9 + $0xb0] sm:$0xf] }
 0x176   :  { %952 = vmatpush.bf16.msra.mxu0 %v1752_v52  ;;  %v2114_v52 = vld [vmem:[%s3312_s7 + $0x28] sm:$0xf0] }
 0x177   :  { %v1756_v55 = vor.u32 %v2114_v52, %v1755_v51 }
 0x178   :  { %927 = vmatpush.bf16.msra.mxu1 %v1736_v15  ;;  %v1930_v15 = vld [vmem:[%s3314_s9 + $0x90] sm:$0xf] }
 0x179   :  { %v1931_v20 = vor.u32 %v2158_v16, %v1930_v15  ;;  %v2141_v15 = vld [vmem:[%s3314_s9 + $0x14] sm:$0xf] }
 0x17a   :  { %953 = vmatpush.bf16.msra.mxu0 %v1740_v60  ;;  %v2111_v60 = vld [vmem:[%s3312_s7 + $0x10] sm:$0xf0] }
 0x17b   :  { %928 = vmatmul.bf16.vlgmr.msra.gmra.mxu1 %v2875_v0  ;;  %v1744_v5 = vor.u32 %v2111_v60, %v1743_v59 }
 0x17d   :  { %954 = vmatmul.bf16.vlgmr.msra.gmra.mxu0 %v2875_v0 }
 0x17e   :  { %1266 = vmatpush.bf16.msrb.mxu0 %v1979_v56 }
 0x182   :  { %1267 = vmatpush.bf16.msrb.mxu0 %v1971_v4  ;;  %v1882_v4 = vld [vmem:[%s3314_s9 + $0x30] sm:$0xf] }
 0x186   :  { %1268 = vmatpush.bf16.msrb.mxu0 %v1963_v9  ;;  %v1884_v9 = vld [vmem:[%s3314_s9 + $0x38] sm:$0xf0] }
 0x187   :  { %v1887_v10 = vor.u32 %v2145_v6, %v1884_v9  ;;  %v2171_v6 = vld [vmem:[%s3314_s9 + $0x104] sm:$0xf]  ;;  %v1988_v9 = vld [vmem:[%s3314_s9 + $0x108] sm:$0xf0] }
 0x18a   :  { %1269 = vmatpush.bf16.msrb.mxu0 %v1955_v1  ;;  %v2144_v1 = vld [vmem:[%s3314_s9 + $0x24] sm:$0xf0] }
 0x1ae   :  { %v2879_v2 = vpop.f32.mrf.mxu2 }
 0x1b6   :  { %v231_v13 = vpop.f32.mrf.mxu2 }
 0x1b7   :  { %v2162_v13 = vld [vmem:[%s3314_s9 + $0xb4] sm:$0xf0] }
 0x1b8   :  { %v1947_v57 = vor.u32 %v2162_v13, %v1946_v12  ;;  %v2143_v12 = vld [vmem:[%s3314_s9 + $0x24] sm:$0xf]  ;;  %v1875_v13 = vor.u32 %v2144_v1, %v1874_v62  ;;  %v2161_v1 = vld [vmem:[%s3314_s9 + $0xb4] sm:$0xf] }
 0x1ba   :  { %1270 = vmatpush.bf16.msrb.mxu0 %v1947_v57 }
 0x1be   :  { %v339_v26 = vpop.f32.mrf.mxu2 }
 0x1bf   :  { %v340_v36 = vadd.f32 %v339_v26, %v254_v25  ;;  %v1816_v25 = vor.u32 %v2129_v22, %v1815_v17  ;;  %v2154_v26 = vld [vmem:[%s3314_s9 + $0x74] sm:$0xf0]  ;;  %v2149_v17 = vld [vmem:[%s3314_s9 + $0x54] sm:$0xf]  ;;  %v1900_v22 = vld [vmem:[%s3314_s9 + $0x58] sm:$0xf0] }
 0x1c0   :  { %v1915_v30 = vor.u32 %v2154_v26, %v1914_v23  ;;  %v2140_v23 = vld [vmem:[%s3314_s9 + $0x4] sm:$0xf0]  ;;  %v2010_v26 = vld [vmem:[%s3314_s9 + $0x130] sm:$0xf] }
 0x1c2   :  { %1253 = vmatpush.bf16.msrb.mxu1 %v1915_v30 }
 0x1c6   :  { %v341_v32 = vpop.f32.mrf.mxu2 }
 0x1c7   :  { %v1916_v32 = vld [vmem:[%s3314_s9 + $0x78] sm:$0xf0] }
 0x1ce   :  { %v474_v33 = vpop.f32.mrf.mxu2 }
 0x1cf   :  { %v475_v35 = vadd.f32 %v474_v33, %v389_v28  ;;  %v1803_v28 = vld [vmem:[%s3312_s7 + $0x80] sm:$0xf]  ;;  %v3047_v33 = vpop.permute.xlu0 %1468 }
 0x1d0   :  { %v1804_v44 = vor.u32 %v2126_v45, %v1803_v28  ;;  %v1903_v28 = vor.u32 %v2149_v17, %v1900_v22  ;;  %v2177_v17 = vld [vmem:[%s3314_s9 + $0x134] sm:$0xf]  ;;  %v2012_v22 = vld [vmem:[%s3314_s9 + $0x138] sm:$0xf0] }
 0x1d1   :  { %v505_v40 = vmul.f32 %v475_v35, %v340_v36  ;;  %v1919_v35 = vor.u32 %v2153_v31, %v1916_v32  ;;  %v1906_v36 = vld [vmem:[%s3314_s9 + $0x60] sm:$0xf]  ;;  %v2178_v31 = vld [vmem:[%s3314_s9 + $0x134] sm:$0xf0]  ;;  %v2139_v32 = vld [vmem:[%s3314_s9 + $0x4] sm:$0xf] }
 0x1d6   :  { %v476_v34 = vpop.f32.mrf.mxu2 }
 0x1d7   :  { %v1923_v34 = vor.u32 %v2156_v21, %v1922_v18  ;;  %v1483_v3 = vpop.permute.xlu0 %1482  ;;  %v1868_v18 = vld [vmem:[%s3314_s9 + $0x18] sm:$0xf0]  ;;  %v1858_v21 = vld [vmem:[%s3314_s9] sm:$0xf] }
 0x1d8   :  { %v1486_v8 = vsel %vm1485_vm3, %v1483_v3, 0.0  ;;  %v1859_v30 = vor.u32 %v2140_v23, %v1858_v21 }
 0x1d9   :  { %v3039_v29 = vpop.f32.mrf.mxu3  ;;  %1487 = vadd.xlane.f32.xlu1 %v1486_v8  ;;  %v2167_v8 = vld [vmem:[%s3314_s9 + $0xe4] sm:$0xf] }
 0x1de   :  { %v610_v39 = vpop.f32.mrf.mxu2 }
 0x1df   :  { %v611_v41 = vadd.f32 %v610_v39, %v525_v63  ;;  %v1907_v39 = vor.u32 %v2152_v37, %v1906_v36  ;;  %v2002_v37 = vld [vmem:[%s3314_s9 + $0x120] sm:$0xf] }
 0x1e1   :  { %v641_v43 = vmul.f32 %v611_v41, %v505_v40  ;;  %v1908_v40 = vld [vmem:[%s3314_s9 + $0x68] sm:$0xf0]  ;;  %v1898_v41 = vld [vmem:[%s3314_s9 + $0x50] sm:$0xf]  ;;  %1254 = vmatpush.bf16.msrb.mxu1 %v1907_v39  ;;  %v968_v45 = vpop.f32.mrf.mxu3 }
 0x1e3   :  { %1732 = vmatmul.msk.f32.vlgmr.msra.gmra.mxu2 %vm216_vm2, %v641_v43  ;;  %v1911_v43 = vor.u32 %v2151_v38, %v1908_v40  ;;  %v2176_v38 = vld [vmem:[%s3314_s9 + $0x124] sm:$0xf0]  ;;  %v1994_v40 = vld [vmem:[%s3314_s9 + $0x110] sm:$0xf] }
 0x1e4   :  { %972 = vmatpush.bf16.msra.mxu2 %v1828_v42  ;;  %v2150_v42 = vld [vmem:[%s3314_s9 + $0x54] sm:$0xf0]  ;;  %v2003_v39 = vor.u32 %v2176_v38, %v2002_v37 }
 0x1e6   :  { %v612_v63 = vpop.f32.mrf.mxu2 }
 0x1e7   :  { %v1890_v63 = vld [vmem:[%s3314_s9 + $0x40] sm:$0xf] }
 0x1e8   :  { %973 = vmatpush.bf16.msra.mxu2 %v1816_v25  ;;  %v1899_v25 = vor.u32 %v2150_v42, %v1898_v41  ;;  %v2174_v41 = vld [vmem:[%s3314_s9 + $0x114] sm:$0xf0] }
 0x1e9   :  { %v1995_v42 = vor.u32 %v2174_v41, %v1994_v40 }
 0x1ea   :  { %1255 = vmatpush.bf16.msrb.mxu1 %v1899_v25  ;;  %v2172_v25 = vld [vmem:[%s3314_s9 + $0x104] sm:$0xf0] }
 0x1eb   :  { %1853 = vmatmul.msk.bf16.vlgmr.msrb.gmra.mxu2 %vm216_vm2, %v2804_v19  ;;  %v2117_v19 = vld [vmem:[%s3312_s7 + $0x40] sm:$0xf0] }
 0x1ec   :  { %974 = vmatpush.bf16.msra.mxu2 %v1804_v44  ;;  %v1768_v50 = vor.u32 %v2117_v19, %v1767_v49  ;;  %v2148_v44 = vld [vmem:[%s3314_s9 + $0x44] sm:$0xf0]  ;;  %v970_v49 = vpop.f32.mrf.mxu3  ;;  %v3088_v19 = vld [vmem:[%s3315_s8] sm:$0x7] }
 0x1f0   :  { %975 = vmatpush.bf16.msra.mxu2 %v1792_v24  ;;  %v1891_v24 = vor.u32 %v2148_v44, %v1890_v63  ;;  %v2004_v63 = vld [vmem:[%s3314_s9 + $0x128] sm:$0xf0]  ;;  %v2169_v44 = vld [vmem:[%s3314_s9 + $0xf4] sm:$0xf] }
 0x1f2   :  { %1256 = vmatpush.bf16.msrb.mxu1 %v1891_v24 }
 0x1f4   :  { %976 = vmatpush.bf16.msra.mxu2 %v1780_v48  ;;  %v1895_v48 = vor.u32 %v2147_v47, %v1892_v27  ;;  %v3091_v53 = vpop.f32.mrf.mxu3  ;;  %v1980_v47 = vld [vmem:[%s3314_s9 + $0xf8] sm:$0xf0] }
 0x1f5   :  { %v1983_v27 = vor.u32 %v2169_v44, %v1980_v47  ;;  %v2188_v44 = vld [vmem:[%s3317_s11 + $0x48] sm:$0xff] }
 0x1f8   :  { %977 = vmatpush.bf16.msra.mxu2 %v1768_v50  ;;  %v752_v50 = vperm.slane %v3088_v19, 1  ;;  %v3096_v59 = vpop.f32.mrf.mxu1 }
 0x1fa   :  { %v955_v51 = vpop.f32.mrf.mxu0 }
 0x1fb   :  { %v956_v52 = vadd.f32 %v955_v51, %v752_v50  ;;  %v2165_v50 = vld [vmem:[%s3314_s9 + $0xd4] sm:$0xf]  ;;  %v1964_v51 = vld [vmem:[%s3314_s9 + $0xd8] sm:$0xf0] }
 0x1fc   :  { %978 = vmatpush.bf16.msra.mxu2 %v1756_v55  ;;  %v996_v58 = vpop.f32.mrf.mxu3 }
 0x1fd   :  { %v969_v54 = vadd.f32 %v968_v45, %v956_v52  ;;  %v2175_v45 = vld [vmem:[%s3314_s9 + $0x124] sm:$0xf]  ;;  %v2173_v52 = vld [vmem:[%s3314_s9 + $0x114] sm:$0xf] }
 0x1fe   :  { %v2007_v3 = vor.u32 %v2175_v45, %v2004_v63 }
 0x1ff   :  { %v999_v46 = vmax.f32 %v969_v54, 0.0 }
 0x200   :  { %979 = vmatpush.bf16.msra.mxu2 %v1744_v5  ;;  %v931_v60 = vpop.f32.mrf.mxu1  ;;  %v2146_v5 = vld [vmem:[%s3314_s9 + $0x34] sm:$0xf0] }
 0x201   :  { %v3093_v55 = vpack.c.bf16 %v999_v46, %v999_v46  ;;  %v1883_v7 = vor.u32 %v2146_v5, %v1882_v4  ;;  %v1967_v46 = vor.u32 %v2165_v50, %v1964_v51  ;;  %v751_v60 = vperm.slane %v3088_v19, 0  ;;  %v2163_v4 = vld [vmem:[%s3314_s9 + $0xc4] sm:$0xf]  ;;  %v1956_v5 = vld [vmem:[%s3314_s9 + $0xc8] sm:$0xf0] }
 0x202   :  { %v957_v56 = vpop.f32.mrf.mxu0 }
 0x203   :  { %980 = vmatmul.bf16.vlgmr.msra.gmra.mxu2 %v2875_v0  ;;  %v2160_v0 = vld [vmem:[%s3314_s9 + $0xa4] sm:$0xf0]  ;;  %1257 = vmatpush.bf16.msrb.mxu1 %v1883_v7  ;;  %v1996_v56 = vld [vmem:[%s3314_s9 + $0x118] sm:$0xf0]  ;;  %v1959_v7 = vor.u32 %v2163_v4, %v1956_v5  ;;  %v930_v62 = vadd.f32 %v3096_v59, %v751_v60  ;;  %v1940_v59 = vld [vmem:[%s3314_s9 + $0xa8] sm:$0xf0] }
 0x204   :  { %v1939_v11 = vor.u32 %v2160_v0, %v1938_v14  ;;  %1292 = vmatpush.bf16.msrb.mxu2 %v1919_v35  ;;  %v1876_v14 = vld [vmem:[%s3314_s9 + $0x28] sm:$0xf0]  ;;  %v1866_v0 = vld [vmem:[%s3314_s9 + $0x10] sm:$0xf]  ;;  %v2011_v35 = vor.u32 %v2178_v31, %v2010_v26  ;;  %v1999_v58 = vor.u32 %v2173_v52, %v1996_v56  ;;  %v2155_v26 = vld [vmem:[%s3314_s9 + $0x84] sm:$0xf] }
 0x205   :  { %v1879_v57 = vor.u32 %v2143_v12, %v1876_v14  ;;  %v1948_v12 = vld [vmem:[%s3314_s9 + $0xb8] sm:$0xf0] }
 0x206   :  { %1271 = vmatpush.bf16.msrb.mxu0 %v1939_v11  ;;  %v2142_v11 = vld [vmem:[%s3314_s9 + $0x14] sm:$0xf0]  ;;  %1283 = vmatpush.bf16.msra.mxu3 %v2011_v35  ;;  %v1951_v14 = vor.u32 %v2161_v1, %v1948_v12 }
 0x207   :  { %1258 = vmatpush.bf16.msrb.mxu1 %v1875_v13  ;;  %v1867_v16 = vor.u32 %v2142_v11, %v1866_v0  ;;  %v2159_v0 = vld [vmem:[%s3314_s9 + $0xa4] sm:$0xf] }
 0x208   :  { %1293 = vmatpush.bf16.msrb.mxu2 %v1911_v43  ;;  %v1986_v43 = vld [vmem:[%s3314_s9 + $0x100] sm:$0xf] }
 0x209   :  { %v1987_v24 = vor.u32 %v2172_v25, %v1986_v43  ;;  %v2182_v43 = vld [vmem:[%s3317_s11 + $0x18] sm:$0xff] }
 0x20a   :  { %1272 = vmatpush.bf16.msrb.mxu0 %v1931_v20  ;;  %v1871_v20 = vor.u32 %v2141_v15, %v1868_v18  ;;  %1284 = vmatpush.bf16.msra.mxu3 %v2003_v39  ;;  %v1943_v15 = vor.u32 %v2159_v0, %v1940_v59  ;;  %v2157_v18 = vld [vmem:[%s3314_s9 + $0x94] sm:$0xf] }
 0x20b   :  { %1259 = vmatpush.bf16.msrb.mxu1 %v1867_v16 }
 0x20c   :  { %1294 = vmatpush.bf16.msrb.mxu2 %v1903_v28  ;;  %v2015_v28 = vor.u32 %v2177_v17, %v2012_v22  ;;  %v2181_v17 = vld [vmem:[%s3317_s11 + $0x10] sm:$0xff]  ;;  %v2180_v22 = vld [vmem:[%s3317_s11 + $0x8] sm:$0xff] }
 0x20e   :  { %1273 = vmatpush.bf16.msrb.mxu0 %v1923_v34  ;;  %v1860_v34 = vld [vmem:[%s3314_s9 + $0x8] sm:$0xf0]  ;;  %1285 = vmatpush.bf16.msra.mxu3 %v1995_v42  ;;  %v2186_v42 = vld [vmem:[%s3317_s11 + $0x38] sm:$0xff] }
 0x20f   :  { %v1863_v36 = vor.u32 %v2139_v32, %v1860_v34  ;;  %1260 = vmatpush.bf16.msrb.mxu1 %v1859_v30  ;;  %v1924_v30 = vld [vmem:[%s3314_s9 + $0x88] sm:$0xf0]  ;;  %v753_v32 = vperm.slane %v3088_v19, 2  ;;  %v2185_v19 = vld [vmem:[%s3317_s11 + $0x30] sm:$0xff] }
 0x210   :  { %1295 = vmatpush.bf16.msrb.mxu2 %v1895_v48  ;;  %v1972_v48 = vld [vmem:[%s3314_s9 + $0xe8] sm:$0xf0]  ;;  %v1927_v31 = vor.u32 %v2155_v26, %v1924_v30 }
 0x211   :  { %1274 = vmatmul.bf16.vlgmr.msrb.gmra.mxu0 %v3093_v55  ;;  %v1975_v49 = vor.u32 %v2167_v8, %v1972_v48 }
 0x212   :  { %1286 = vmatpush.bf16.msra.mxu3 %v1987_v24  ;;  %1422 = vmatpush.bf16.msra.mxu0 %v2186_v42  ;;  %v2187_v24 = vld [vmem:[%s3317_s11 + $0x40] sm:$0xff] }
 0x213   :  { %1322 = vmatpush.bf16.msra.mxu1 %v2015_v28  ;;  %v2179_v28 = vld [vmem:[%s3317_s11] sm:$0xff] }
 0x214   :  { %1296 = vmatpush.bf16.msrb.mxu2 %v1887_v10  ;;  %v1991_v10 = vor.u32 %v2171_v6, %v1988_v9  ;;  %v2195_v42 = vld [vmem:[#allocation2] ss:$0 sm:$0xff] }
 0x216   :  { %1305 = vmatpush.bf16.msrb.mxu3 %v1983_v27  ;;  %1423 = vmatpush.bf16.msra.mxu0 %v2185_v19 }
 0x217   :  { %1323 = vmatpush.bf16.msra.mxu1 %v2007_v3  ;;  %v1044_v3 = vld [vmem:[%s3318_s10] sm:$0x3] }
 0x218   :  { %1297 = vmatpush.bf16.msrb.mxu2 %v1879_v57  ;;  %v1046_v27 = vperm.slane %v1044_v3, 0  ;;  %v1047_v60 = vperm.slane %v1044_v3, 1 }
 0x21a   :  { %1306 = vmatpush.bf16.msrb.mxu3 %v1975_v49 }
 0x21b   :  { %1324 = vmatpush.bf16.msra.mxu1 %v1999_v58 }
 0x21c   :  { %1298 = vmatpush.bf16.msrb.mxu2 %v1871_v20  ;;  %v1932_v20 = vld [vmem:[%s3314_s9 + $0x98] sm:$0xf0] }
 0x21d   :  { %v1935_v23 = vor.u32 %v2157_v18, %v1932_v20 }
 0x21e   :  { %1307 = vmatpush.bf16.msrb.mxu3 %v1967_v46 }
 0x21f   :  { %1325 = vmatpush.bf16.msra.mxu1 %v1991_v10 }
 0x220   :  { %1299 = vmatpush.bf16.msrb.mxu2 %v1863_v36 }
 0x222   :  { %1308 = vmatpush.bf16.msrb.mxu3 %v1959_v7 }
 0x226   :  { %1309 = vmatpush.bf16.msrb.mxu3 %v1951_v14 }
 0x22a   :  { %1310 = vmatpush.bf16.msrb.mxu3 %v1943_v15 }
 0x22e   :  { %1311 = vmatpush.bf16.msrb.mxu3 %v1935_v23 }
 0x232   :  { %1312 = vmatpush.bf16.msrb.mxu3 %v1927_v31 }
 0x24c   :  { %v1488_v19 = vpop.xlane.xlu1 %1487 }
 0x266   :  { %v3203_v54 = vpop.f32.mrf.mxu2 }
 0x26e   :  { %v942_v13 = vpop.f32.mrf.mxu2 }
 0x26f   :  { %v943_v57 = vadd.f32 %v942_v13, %v930_v62  ;;  %v2196_v13 = vld [vmem:[%s3316_s12] ss:$0 sm:$0xff] }
 0x271   :  { %v998_v11 = vmax.f32 %v943_v57, 0.0 }
 0x273   :  { %v1001_v16 = vpack.c.bf16 %v998_v11, %v998_v11 }
 0x275   :  { %1261 = vmatmul.bf16.vlgmr.msrb.gmra.mxu1 %v1001_v16  ;;  %1300 = vmatmul.bf16.vlgmr.msrb.gmra.mxu2 %v1001_v16 }
 0x276   :  { %v944_v21 = vpop.f32.mrf.mxu2  ;;  %1441 = vmatpush.bf16.msrb.mxu1 %v2188_v44 }
 0x27a   :  { %1442 = vmatpush.bf16.msrb.mxu1 %v2187_v24 }
 0x286   :  { %v981_v34 = vpop.f32.mrf.mxu2 }
 0x287   :  { %v982_v35 = vadd.f32 %v981_v34, %v753_v32 }
 0x289   :  { %v995_v36 = vadd.f32 %v3091_v53, %v982_v35  ;;  %v2184_v53 = vld [vmem:[%s3317_s11 + $0x28] sm:$0xff] }
 0x28a   :  { %1424 = vmatpush.bf16.msra.mxu0 %v2184_v53 }
 0x28b   :  { %v1000_v37 = vmax.f32 %v995_v36, 0.0  ;;  %v705_v36 = vadd.f32 %v3203_v54, %v3039_v29 }
 0x28d   :  { %v1003_v38 = vpack.c.bf16 %v1000_v37, %v1000_v37  ;;  %v2203_v37 = vmov 0.0  }
 0x28e   :  { %v983_v39 = vpop.f32.mrf.mxu2  ;;  %v1275_v40 = vpop.f32.mrf.mxu0 }
 0x28f   :  { %2016 = vmatmul.msk.bf16.vlgmr.msra.gmra.mxu3 %vm177_vm1, %v1003_v38  ;;  %2017 = vmatmul.msk.bf16.vlgmr.msra.gmra.mxu1 %vm177_vm1, %v1003_v38 }
 0x296   :  { %v1277_v41 = vpop.f32.mrf.mxu0 }
 0x297   :  { %v2194_v41 = vld [vmem:[#allocation3] ss:$0 sm:$0xff] }
 0x298   :  { %v230_v53 = vadd.f32 %v2194_v41, %v2879_v2 }
 0x29f   :  { %1313 = vmatmul.bf16.vlgmr.msrb.gmra.mxu3 %v3093_v55  ;;  %v2183_v55 = vld [vmem:[%s3317_s11 + $0x20] sm:$0xff] }
 0x2a0   :  { %1425 = vmatpush.bf16.msra.mxu0 %v2183_v55  ;;  %v237_v55 = vadd.f32 %v2195_v42, %v2771_v61 }
 0x2a4   :  { %1426 = vmatpush.bf16.msra.mxu0 %v2182_v43  ;;  %v1491_v43 = vadd.f32 %v1488_v19, %v2771_v61 }
 0x2a6   :  { %v1492_v54 = vmul.f32 0.01, %v1491_v43 }
 0x2a8   :  { %1427 = vmatpush.bf16.msra.mxu0 %v2181_v17  ;;  %v238_v17 = vadd.f32 %v237_v55, %v230_v53 }
 0x2ac   :  { %1428 = vmatpush.bf16.msra.mxu0 %v2180_v22 }
 0x2b0   :  { %1429 = vmatpush.bf16.msra.mxu0 %v2179_v28 }
 0x2f2   :  { %v1262_v25 = vpop.f32.mrf.mxu1 }
 0x2f3   :  { %v1263_v48 = vadd.f32 %v1262_v25, %v1046_v27 }
 0x2f5   :  { %v1276_v49 = vadd.f32 %v1275_v40, %v1263_v48 }
 0x2f8   :  { %v1301_v45 = vpop.f32.mrf.mxu2 }
 0x2f9   :  { %v1302_v4 = vadd.f32 %v1301_v45, %v1047_v60 }
 0x2fa   :  { %v1264_v63 = vpop.f32.mrf.mxu1 }
 0x300   :  { %v1303_v47 = vpop.f32.mrf.mxu2 }
 0x30c   :  { %v1327_v8 = vpop.f32.mrf.mxu1 }
 0x312   :  { %v1288_v50 = vpop.f32.mrf.mxu3 }
 0x313   :  { %v1289_v51 = vadd.f32 %v1288_v50, %v1276_v49 }
 0x314   :  { %v1329_v52 = vpop.f32.mrf.mxu1 }
 0x315   :  { %v1331_v46 = vmax.f32 %v1289_v51, 0.0 }
 0x317   :  { %v1333_v56 = vpack.c.bf16 %v1331_v46, %v1331_v46 }
 0x319   :  { %1430 = vmatmul.bf16.vlgmr.msra.gmra.mxu0 %v1333_v56 }
 0x31a   :  { %v1290_v58 = vpop.f32.mrf.mxu3 }
 0x322   :  { %v1314_v5 = vpop.f32.mrf.mxu3 }
 0x323   :  { %v1315_v6 = vadd.f32 %v1314_v5, %v1302_v4 }
 0x325   :  { %v1328_v7 = vadd.f32 %v1327_v8, %v1315_v6 }
 0x327   :  { %v1332_v9 = vmax.f32 %v1328_v7, 0.0 }
 0x329   :  { %v1334_v10 = vpack.c.bf16 %v1332_v9, %v1332_v9 }
 0x32a   :  { %v1316_v62 = vpop.f32.mrf.mxu3 }
 0x32b   :  { %2058 = vmatmul.msk.bf16.vlgmr.msrb.gmra.mxu1 %vm216_vm2, %v1334_v10 }
 0x396   :  { %v1431_v1 = vpop.f32.mrf.mxu0 }
 0x397   :  { %v1432_v14 = vadd.f32 %v2196_v13, %v1431_v1 }
 0x39e   :  { %v1433_v12 = vpop.f32.mrf.mxu0 }
 0x3a8   :  { %v1444_v57 = vpop.f32.mrf.mxu1 }
 0x3a9   :  { %v1445_v0 = vadd.f32 %v1444_v57, %v1432_v14 }
 0x3ab   :  { %v2059_v59 = vmul.f32 -1.442695, %v1445_v0 }
 0x3ad   :  { %2197 = vpow2.f32 %v2059_v59 }
 0x3b0   :  { %v1446_v11 = vpop.f32.mrf.mxu1 }
 0x3b3   :  { %v2198_v15 = vpop.eup %2197 }
 0x3b4   :  { %v1451_v16 = vadd.f32 1.0, %v2198_v15 }
 0x3b6   :  { %2199 = vrcp.f32 %v1451_v16  ;;  %v1463_v23 = vand.u32 2147483648, %v1451_v16  ;;  %v1461_v30 = vand.u32 2147483647, %v1451_v16  ;;  %vm1457_vm5 = vweird.f32 %v1451_v16 }
 0x3b8   :  { %v1464_v32 = vor.u32 1.1754944e-38, %v1463_v23  ;;  %vm1462_vm7 = vcmp.eq.f32.partialorder %v1461_v30, 8.507059e+37 }
 0x3bc   :  { %v2200_v18 = vpop.eup %2199 }
 0x3bd   :  { %v1453_v20 = vmul.f32 %v2200_v18, %v1451_v16  ;;  %vm1458_vm4 = vweird.f32 %v2200_v18 }
 0x3be   :  { %vm1459_vm6 = vmor %vm1457_vm5, %vm1458_vm4 }
 0x3bf   :  { %v1454_v21 = vsub.f32 1.0, %v1453_v20 }
 0x3c1   :  { %v1455_v26 = vmul.f32 %v2200_v18, %v1454_v21 }
 0x3c3   :  { %v1456_v31 = vadd.f32 %v2200_v18, %v1455_v26 }
 0x3c5   :  { %v1460_v34 = vsel %vm1459_vm6, %v2200_v18, %v1456_v31 }
 0x3c6   :  { %v1465_v35 = vsel %vm1462_vm7, %v1464_v32, %v1460_v34 }
 0x3c7   :  { %vm1471_vm8 = vcmp.ge.f32.partialorder %v1465_v35, %v3047_v33 }
 0x3c8   :  { %v2060_v38 = vsel %vm1471_vm8, 1.0, %v2203_v37 }
 0x3c9   :  { %v1474_v39 = vmul.f32 %v2060_v38, %v705_v36 }
 0x3cb   :  { %v1476_v40 = vsel %vm1475_vm9, %v1474_v39, 0.0 }
 0x3cc   :  { %1477 = vadd.xlane.f32.xlu1 %v1476_v40 }
 0x43f   :  { %v1478_v29 = vpop.xlane.xlu1 %1477 }
 0x440   :  { %v1479_v33 = vadd.f32 %v1478_v29, %v238_v17 }
 0x442   :  { %1490 = vst.msk [vmem:[%s3319_s19] sm:$0xff] %vm1489_vm10, %v1479_v33 }
 0x443   :  { %1494 = vst.msk [vmem:[%s3319_s19] sm:$0xff] %vm1493_vm11, %v1492_v54 }

</bundles_post_ra>
